<compile_context>
chip_gen: v6e
topology: v6e:2x2x1
jax: 0.10.0
libtpu: 0.0.40
codegen_flags: <defaults>
</compile_context>

<pallas_src>
import jax
import jax.numpy as jnp
import numpy as np
from jax.experimental import pallas as pl
from jax.experimental.pallas import tpu as pltpu


def _round_up(x, m):
    return (x + m - 1) // m * m


def deep_gp_mlp_kernel(x_ref, w1_ref, b1_ref, w2_ref, b2_ref, w3t_ref, b3t_ref, o_ref):
    """Fused 3-layer MLP: tanh(xW1+b1) -> tanh(.W2+b2) -> final layer produced transposed."""
    x = x_ref[...]                                   # (TILE_N, d_in)  bf16
    w1 = w1_ref[...]                                 # (d_in, d_h1)    bf16
    w2 = w2_ref[...]                                 # (d_h1, d_h2)    bf16
    w3t = w3t_ref[...]                               # (d_out, d_h2)   bf16
    b1 = b1_ref[...]                                 # (1, d_h1)       f32
    b2 = b2_ref[...]                                 # (1, d_h2)       f32
    b3t = b3t_ref[...]                               # (d_out, 1)      f32

    # MXU matmuls with f32 accumulation; bias add + tanh stay f32 on VPU/EUP.
    h = jnp.tanh(jnp.dot(x, w1, preferred_element_type=jnp.float32) + b1)
    h = jnp.tanh(jnp.dot(h.astype(w2.dtype), w2, preferred_element_type=jnp.float32) + b2)

    # (d_out, TILE_N): contract the last dims of (d_out, d_h2) and (TILE_N, d_h2)  (NT pattern).
    out_t = jax.lax.dot_general(
        w3t, h.astype(w3t.dtype),
        dimension_numbers=(((1,), (1,)), ((), ())),
        preferred_element_type=jnp.float32,
    ) + b3t

    o_ref[...] = out_t.astype(o_ref.dtype)           # lane-dense (d_out, TILE_N) store


def standard_deep_gp_forward(x, params, *, tile_n=1024):
    """x: [..., dim] float32.  Returns hidden: [..., out_features] float32."""
    (w1, b1), (w2, b2), (w3, b3) = params
    d_in, d_h1 = w1.shape
    d_h2, d_out = w3.shape
    lead = x.shape[:-1]

    x2d = x.reshape(-1, d_in)
    n = x2d.shape[0]
    tile_n = max(8, _round_up(tile_n, 8))            # sublane multiple
    n_pad = _round_up(max(n, 1), tile_n)
    if n_pad != n:
        x2d = jnp.pad(x2d, ((0, n_pad - n), (0, 0)))

    # bf16 MXU operands (halves HBM read traffic for x); biases stay f32.
    x_bf = x2d.astype(jnp.bfloat16)
    w1_bf = w1.astype(jnp.bfloat16)
    w2_bf = w2.astype(jnp.bfloat16)
    w3t_bf = w3.T.astype(jnp.bfloat16)               # (d_out, d_h2)
    b3t = b3.reshape(d_out, 1).astype(jnp.float32)   # (d_out, 1)

    grid = (n_pad // tile_n,)
    resident = lambda i: (0, 0)                      # same block every step -> stays in VMEM

    flops = 2 * n_pad * (d_in * d_h1 + d_h1 * d_h2 + d_h2 * d_out)
    transcendentals = n_pad * (d_h1 + d_h2)
    bytes_accessed = (n_pad * d_in * 2 + n_pad * d_out * 4
                      + (w1.size + w2.size + w3.size) * 2
                      + (b1.size + b2.size + b3.size) * 4)

    out_t = pl.pallas_call(
        deep_gp_mlp_kernel,
        out_shape=jax.ShapeDtypeStruct((d_out, n_pad), jnp.float32),
        grid=grid,
        in_specs=[
            pl.BlockSpec((tile_n, d_in), lambda i: (i, 0)),   # streamed row tiles of x
            pl.BlockSpec(w1_bf.shape, resident),
            pl.BlockSpec(b1.shape, resident),
            pl.BlockSpec(w2_bf.shape, resident),
            pl.BlockSpec(b2.shape, resident),
            pl.BlockSpec(w3t_bf.shape, resident),
            pl.BlockSpec(b3t.shape, resident),
        ],
        out_specs=pl.BlockSpec((d_out, tile_n), lambda i: (0, i)),
        compiler_params=pltpu.CompilerParams(dimension_semantics=("parallel",)),
        cost_estimate=pl.CostEstimate(
            flops=flops, transcendentals=transcendentals, bytes_accessed=bytes_accessed),
    )(x_bf, w1_bf, b1, w2_bf, b2, w3t_bf, b3t)

    out2d = out_t.T[:n]                              # back to [N, d_out] (layout plumbing)
    return out2d.reshape(*lead, d_out)


def init_params(key, d_in, output_sizes):
    """Deterministic PyTorch-Linear-like init: U(-1/sqrt(fan_in), 1/sqrt(fan_in))."""
    params = []
    dims = [d_in] + list(output_sizes)
    for i in range(len(output_sizes)):
        key, kw, kb = jax.random.split(key, 3)
        bound = 1.0 / np.sqrt(dims[i])
        w = jax.random.uniform(kw, (dims[i], dims[i + 1]), jnp.float32, -bound, bound)
        b = jax.random.uniform(kb, (1, dims[i + 1]), jnp.float32, -bound, bound)
        params.append((w, b))
    return params


def reference_forward_f32(x, params):
    """Pure-f32 reference matching the PyTorch module (dropout p=0.0 elided)."""
    (w1, b1), (w2, b2), (w3, b3) = params
    h = jnp.tanh(x @ w1 + b1[0])
    h = jnp.tanh(h @ w2 + b2[0])
    return h @ w3 + b3[0]


def reference_forward_bf16(x, params):
    """Reference with the same bf16-operand / f32-accumulate numerics as the kernel."""
    (w1, b1), (w2, b2), (w3, b3) = params
    bf = jnp.bfloat16
    h = jnp.tanh(jnp.dot(x.astype(bf), w1.astype(bf), preferred_element_type=jnp.float32) + b1[0])
    h = jnp.tanh(jnp.dot(h.astype(bf), w2.astype(bf), preferred_element_type=jnp.float32) + b2[0])
    return jnp.dot(h.astype(bf), w3.astype(bf), preferred_element_type=jnp.float32) + b3[0]


if __name__ == "__main__":
    # configuration = {'dim': 16, 'output_size_A': [32, 32, 8], 'dropout': 0.0}
    dim = 16
    output_size_A = [32, 32, 8]
    params = init_params(jax.random.PRNGKey(0), dim, output_size_A)

    key = jax.random.PRNGKey(0)
    _, kx1, kx2 = jax.random.split(key, 3)

    # Small shape consistent with the module: batch=2, seq=8, dim=16.
    x_small = jax.random.normal(kx1, (2, 8, dim), dtype=jnp.float32)
    out_small = jax.block_until_ready(standard_deep_gp_forward(x_small, params))
    assert out_small.shape == (2, 8, output_size_A[-1])
    np.testing.assert_allclose(np.asarray(out_small),
                               np.asarray(reference_forward_bf16(x_small, params)),
                               rtol=5e-3, atol=5e-3)
    np.testing.assert_allclose(np.asarray(out_small),
                               np.asarray(reference_forward_f32(x_small, params)),
                               rtol=5e-2, atol=5e-2)

    # Larger shape: exercises the multi-step grid and the N % TILE_N remainder padding.
    x_big = jax.random.normal(kx2, (4, 1000, dim), dtype=jnp.float32)
    out_big = jax.block_until_ready(standard_deep_gp_forward(x_big, params))
    assert out_big.shape == (4, 1000, output_size_A[-1])
    np.testing.assert_allclose(np.asarray(out_big),
                               np.asarray(reference_forward_bf16(x_big, params)),
                               rtol=5e-3, atol=5e-3)

    # TODO(synk): training-mode Dropout (p > 0) is not implemented; config uses p=0.0 (identity).
    print("KERNEL_OK")
</pallas_src>

<mosaic_0001>
module attributes {stable_mosaic.version = 11 : i64} {
  func.func @deep_gp_mlp_kernel(%arg0: i32, %arg1: memref<1024x16xbf16, #tpu.memory_space<vmem>>, %arg2: memref<16x32xbf16, #tpu.memory_space<vmem>>, %arg3: memref<1x32xf32, #tpu.memory_space<vmem>>, %arg4: memref<32x32xbf16, #tpu.memory_space<vmem>>, %arg5: memref<1x32xf32, #tpu.memory_space<vmem>>, %arg6: memref<8x32xbf16, #tpu.memory_space<vmem>>, %arg7: memref<8x1xf32, #tpu.memory_space<vmem>>, %arg8: memref<8x1024xf32, #tpu.memory_space<vmem>>) attributes {dimension_semantics = [#tpu.dimension_semantics<parallel>], iteration_bounds = array<i64: 1>, scalar_prefetch = 0 : i64, scratch_operands = 0 : i64, tpu.core_type = #tpu.core_type<tc>, window_params = [{transform_indices = @transform_0, window_bounds = array<i64: 1024, 16>}, {pipeline_mode = #tpu.pipeline_mode<synchronous>, transform_indices = @transform_1, window_bounds = array<i64: 16, 32>}, {pipeline_mode = #tpu.pipeline_mode<synchronous>, transform_indices = @transform_2, window_bounds = array<i64: 1, 32>}, {pipeline_mode = #tpu.pipeline_mode<synchronous>, transform_indices = @transform_3, window_bounds = array<i64: 32, 32>}, {pipeline_mode = #tpu.pipeline_mode<synchronous>, transform_indices = @transform_4, window_bounds = array<i64: 1, 32>}, {pipeline_mode = #tpu.pipeline_mode<synchronous>, transform_indices = @transform_5, window_bounds = array<i64: 8, 32>}, {pipeline_mode = #tpu.pipeline_mode<synchronous>, transform_indices = @transform_6, window_bounds = array<i64: 8, 1>}, {transform_indices = @transform_7, window_bounds = array<i64: 8, 1024>}]} {
    %c0 = arith.constant 0 : index
    %c0_0 = arith.constant 0 : index
    %0 = vector.load %arg1[%c0, %c0_0] : memref<1024x16xbf16, #tpu.memory_space<vmem>>, vector<1024x16xbf16>
    %c0_1 = arith.constant 0 : index
    %c0_2 = arith.constant 0 : index
    %1 = vector.load %arg2[%c0_1, %c0_2] : memref<16x32xbf16, #tpu.memory_space<vmem>>, vector<16x32xbf16>
    %c0_3 = arith.constant 0 : index
    %c0_4 = arith.constant 0 : index
    %2 = vector.load %arg4[%c0_3, %c0_4] : memref<32x32xbf16, #tpu.memory_space<vmem>>, vector<32x32xbf16>
    %c0_5 = arith.constant 0 : index
    %c0_6 = arith.constant 0 : index
    %3 = vector.load %arg6[%c0_5, %c0_6] : memref<8x32xbf16, #tpu.memory_space<vmem>>, vector<8x32xbf16>
    %c0_7 = arith.constant 0 : index
    %c0_8 = arith.constant 0 : index
    %4 = vector.load %arg3[%c0_7, %c0_8] : memref<1x32xf32, #tpu.memory_space<vmem>>, vector<1x32xf32>
    %c0_9 = arith.constant 0 : index
    %c0_10 = arith.constant 0 : index
    %5 = vector.load %arg5[%c0_9, %c0_10] : memref<1x32xf32, #tpu.memory_space<vmem>>, vector<1x32xf32>
    %c0_11 = arith.constant 0 : index
    %c0_12 = arith.constant 0 : index
    %6 = vector.load %arg7[%c0_11, %c0_12] : memref<8x1xf32, #tpu.memory_space<vmem>>, vector<8x1xf32>
    %cst = arith.constant dense<0.000000e+00> : vector<1024x32xf32>
    %7 = tpu.matmul %0, %1, %cst {dimension_numbers = #tpu.dot_dimension_numbers<[1], [0], [0], [1], [0, 0, 1, 1], [], []>} : vector<1024x16xbf16>, vector<16x32xbf16>, vector<1024x32xf32> -> vector<1024x32xf32>
    %8 = vector.broadcast %4 : vector<1x32xf32> to vector<1024x32xf32>
    %9 = arith.addf %7, %8 : vector<1024x32xf32>
    %10 = math.tanh %9 : vector<1024x32xf32>
    %11 = arith.truncf %10 : vector<1024x32xf32> to vector<1024x32xbf16>
    %cst_13 = arith.constant dense<0.000000e+00> : vector<1024x32xf32>
    %12 = tpu.matmul %11, %2, %cst_13 {dimension_numbers = #tpu.dot_dimension_numbers<[1], [0], [0], [1], [0, 0, 1, 1], [], []>} : vector<1024x32xbf16>, vector<32x32xbf16>, vector<1024x32xf32> -> vector<1024x32xf32>
    %13 = vector.broadcast %5 : vector<1x32xf32> to vector<1024x32xf32>
    %14 = arith.addf %12, %13 : vector<1024x32xf32>
    %15 = math.tanh %14 : vector<1024x32xf32>
    %16 = arith.truncf %15 : vector<1024x32xf32> to vector<1024x32xbf16>
    %cst_14 = arith.constant dense<0.000000e+00> : vector<8x1024xf32>
    %17 = tpu.matmul %3, %16, %cst_14 {dimension_numbers = #tpu.dot_dimension_numbers<[1], [1], [0], [0], [0, 0, 1, 0], [], []>} : vector<8x32xbf16>, vector<1024x32xbf16>, vector<8x1024xf32> -> vector<8x1024xf32>
    %18 = vector.broadcast %6 : vector<8x1xf32> to vector<8x1024xf32>
    %19 = arith.addf %17, %18 : vector<8x1024xf32>
    %c0_15 = arith.constant 0 : index
    %c0_16 = arith.constant 0 : index
    %20 = vector.load %arg8[%c0_15, %c0_16] : memref<8x1024xf32, #tpu.memory_space<vmem>>, vector<8x1024xf32>
    tpu.vector_store %arg8[%c0_15, %c0_16], %19 {strides = array<i32>} : memref<8x1024xf32, #tpu.memory_space<vmem>>, vector<8x1024xf32>,
    return
  }
  func.func @transform_0(%arg0: i32) -> (i32, i32) {
    %c0_i32 = arith.constant 0 : i32
    %c0_i32_0 = arith.constant 0 : i32
    return %arg0, %c0_i32 : i32, i32
  }
  func.func @transform_1(%arg0: i32) -> (i32, i32) {
    %c0_i32 = arith.constant 0 : i32
    %c0_i32_0 = arith.constant 0 : i32
    %c0_i32_1 = arith.constant 0 : i32
    return %c0_i32, %c0_i32_0 : i32, i32
  }
  func.func @transform_2(%arg0: i32) -> (i32, i32) {
    %c0_i32 = arith.constant 0 : i32
    %c0_i32_0 = arith.constant 0 : i32
    %c0_i32_1 = arith.constant 0 : i32
    return %c0_i32, %c0_i32_0 : i32, i32
  }
  func.func @transform_3(%arg0: i32) -> (i32, i32) {
    %c0_i32 = arith.constant 0 : i32
    %c0_i32_0 = arith.constant 0 : i32
    %c0_i32_1 = arith.constant 0 : i32
    return %c0_i32, %c0_i32_0 : i32, i32
  }
  func.func @transform_4(%arg0: i32) -> (i32, i32) {
    %c0_i32 = arith.constant 0 : i32
    %c0_i32_0 = arith.constant 0 : i32
    %c0_i32_1 = arith.constant 0 : i32
    return %c0_i32, %c0_i32_0 : i32, i32
  }
  func.func @transform_5(%arg0: i32) -> (i32, i32) {
    %c0_i32 = arith.constant 0 : i32
    %c0_i32_0 = arith.constant 0 : i32
    %c0_i32_1 = arith.constant 0 : i32
    return %c0_i32, %c0_i32_0 : i32, i32
  }
  func.func @transform_6(%arg0: i32) -> (i32, i32) {
    %c0_i32 = arith.constant 0 : i32
    %c0_i32_0 = arith.constant 0 : i32
    %c0_i32_1 = arith.constant 0 : i32
    return %c0_i32, %c0_i32_0 : i32, i32
  }
  func.func @transform_7(%arg0: i32) -> (i32, i32) {
    %c0_i32 = arith.constant 0 : i32
    %c0_i32_0 = arith.constant 0 : i32
    return %c0_i32, %arg0 : i32, i32
  }
}

</mosaic_0001>

<bundles_post_ra>
// kernel: tpu_custom_call.1
= control target key start
LH: loop header
LB: loop body
LE: loop exit
PB: predicated region body
PF: predicated region fallthrough
CT: control target
= control target key end

     0   :  { %vm498_vm0 = vcmask 130048   ;;  %s5155_s0 = inlined_call_operand.vmem [shape: bf16[1024,16], index: 0, kind: input, shape index: {}]   ;;  %s5156_s1 = inlined_call_operand.vmem [shape: bf16[16,32], index: 1, kind: input, shape index: {}]   ;;  %s5157_s2 = inlined_call_operand.vmem [shape: f32[1,32], index: 2, kind: input, shape index: {}]   ;;  %s5158_s3 = inlined_call_operand.vmem [shape: bf16[32,32], index: 3, kind: input, shape index: {}]   ;;  %s5159_s4 = inlined_call_operand.vmem [shape: f32[1,32], index: 4, kind: input, shape index: {}]   ;;  %s5160_s5 = inlined_call_operand.vmem [shape: bf16[8,32], index: 5, kind: input, shape index: {}]   ;;  %s5161_s6 = inlined_call_operand.vmem [shape: f32[8,1], index: 6, kind: input, shape index: {}]   ;;  %s5162_s7 = inlined_call_operand.hbm [shape: f32[8,1024], index: 7, kind: output, shape index: {}]  }
   0x1   :  { %v3463_v0 = vld [vmem:[%s5156_s1] sm:$0xff]   ;;  %v3465_v2 = vld [vmem:[%s5155_s0 + $0x8] sm:$0xff]   ;;  %v3466_v3 = vld [vmem:[%s5155_s0 + $0x10] sm:$0xff]  }
   0x2   :  { %v3464_v1 = vld [vmem:[%s5155_s0] sm:$0xff]   ;;  %3166 = vmatprep.subr.bf16.mxu0 %v3463_v0  ;;  %v3467_v4 = vld [vmem:[%s5155_s0 + $0x18] sm:$0xff]   ;;  %v3469_v6 = vld [vmem:[%s5155_s0 + $0x28] sm:$0xff]  }
   0x3   :  { %3167 = vmatpush3.bf16.msra.mxu0 %v3463_v0  ;;  %3168 = vmatprep.mubr.msk.bf16.mxu0 %vm498_vm0, %v3464_v1  ;;  %v3468_v5 = vld [vmem:[%s5155_s0 + $0x20] sm:$0xff]   ;;  %v3470_v7 = vld [vmem:[%s5155_s0 + $0x30] sm:$0xff]   ;;  %v3471_v8 = vld [vmem:[%s5155_s0 + $0x38] sm:$0xff]  }
   0x4   :  { %v3472_v9 = vld [vmem:[%s5155_s0 + $0x40] sm:$0xff]   ;;  %v3473_v10 = vld [vmem:[%s5155_s0 + $0x48] sm:$0xff]   ;;  %v3474_v11 = vld [vmem:[%s5155_s0 + $0x50] sm:$0xff]  }
   0x5   :  { %v3475_v12 = vld [vmem:[%s5155_s0 + $0x58] sm:$0xff]   ;;  %v3476_v13 = vld [vmem:[%s5155_s0 + $0x60] sm:$0xff]   ;;  %v3477_v14 = vld [vmem:[%s5155_s0 + $0x68] sm:$0xff]  }
   0x6   :  { %3169 = vmatmul.mubr.msk.bf16.vlgmr.msra.gmra.mxu0 %vm498_vm0, %v3465_v2  ;;  %v3478_v15 = vld [vmem:[%s5155_s0 + $0x70] sm:$0xff]   ;;  %v3479_v16 = vld [vmem:[%s5155_s0 + $0x78] sm:$0xff]   ;;  %v3480_v17 = vld [vmem:[%s5155_s0 + $0x80] sm:$0xff]  }
   0x7   :  { %3172 = vmatprep.mubr.msk.bf16.mxu0 %vm498_vm0, %v3466_v3 }
   0xe   :  { %3173 = vmatmul.mubr.msk.bf16.gmra.mxu0 %vm498_vm0, %v3467_v4 }
   0xf   :  { %3176 = vmatprep.mubr.msk.bf16.mxu0 %vm498_vm0, %v3468_v5 }
  0x16   :  { %3177 = vmatmul.mubr.msk.bf16.gmra.mxu0 %vm498_vm0, %v3469_v6 }
  0x17   :  { %3180 = vmatprep.mubr.msk.bf16.mxu0 %vm498_vm0, %v3470_v7 }
  0x1e   :  { %3181 = vmatmul.mubr.msk.bf16.gmra.mxu0 %vm498_vm0, %v3471_v8 }
  0x1f   :  { %3184 = vmatprep.mubr.msk.bf16.mxu0 %vm498_vm0, %v3472_v9 }
  0x26   :  { %3185 = vmatmul.mubr.msk.bf16.gmra.mxu0 %vm498_vm0, %v3473_v10 }
  0x27   :  { %3188 = vmatprep.mubr.msk.bf16.mxu0 %vm498_vm0, %v3474_v11 }
  0x2e   :  { %3189 = vmatmul.mubr.msk.bf16.gmra.mxu0 %vm498_vm0, %v3475_v12 }
  0x2f   :  { %3192 = vmatprep.mubr.msk.bf16.mxu0 %vm498_vm0, %v3476_v13 }
  0x36   :  { %3193 = vmatmul.mubr.msk.bf16.gmra.mxu0 %vm498_vm0, %v3477_v14 }
  0x37   :  { %3196 = vmatprep.mubr.msk.bf16.mxu0 %vm498_vm0, %v3478_v15 }
  0x38   :  { %12 = vsyncpa [#allocation3], 0  ;;  %v3481_v18 = vld [vmem:[%s5155_s0 + $0x88] sm:$0xff]   ;;  %v3482_v19 = vld [vmem:[%s5155_s0 + $0x90] sm:$0xff]   ;;  %vm1446_vm1 = vcmask 261120  }
  0x39   :  { %v3483_v20 = vld [vmem:[%s5155_s0 + $0x98] sm:$0xff]   ;;  %v3484_v21 = vld [vmem:[%s5155_s0 + $0xa0] sm:$0xff]   ;;  %v3485_v22 = vld [vmem:[%s5155_s0 + $0xa8] sm:$0xff]  }
  0x3a   :  { %v3486_v23 = vld [vmem:[%s5155_s0 + $0xb0] sm:$0xff]   ;;  %v3516_v24 = vld [vmem:[%s5158_s3 + $0x8] sm:$0xff]   ;;  %v3487_v25 = vld [vmem:[%s5155_s0 + $0xb8] sm:$0xff]  }
  0x3b   :  { %3296 = vmatprep.subr.bf16.mxu1 %v3516_v24  ;;  %v3519_v26 = vld [vmem:[%s5158_s3] sm:$0xff]   ;;  %v3489_v28 = vld [vmem:[%s5155_s0 + $0xc8] sm:$0xff]   ;;  %v3490_v29 = vld [vmem:[%s5155_s0 + $0xd0] sm:$0xff]  }
  0x3c   :  { %3297 = vmatpush3.bf16.msra.mxu1 %v3516_v24  ;;  %v3488_v27 = vld [vmem:[%s5155_s0 + $0xc0] sm:$0xff]   ;;  %v3491_v30 = vld [vmem:[%s5155_s0 + $0xd8] sm:$0xff]   ;;  %v3493_v32 = vld [vmem:[%s5155_s0 + $0xe8] sm:$0xff]  }
  0x3d   :  { %3298 = vmatprep.subr.bf16.mxu1 %v3519_v26  ;;  %v3492_v31 = vld [vmem:[%s5155_s0 + $0xe0] sm:$0xff]   ;;  %v3494_v33 = vld [vmem:[%s5155_s0 + $0xf0] sm:$0xff]   ;;  %v3495_v34 = vld [vmem:[%s5155_s0 + $0xf8] sm:$0xff]  }
  0x3e   :  { %3197 = vmatmul.mubr.msk.bf16.gmra.mxu0 %vm498_vm0, %v3479_v16  ;;  %v3496_v35 = vld [vmem:[%s5155_s0 + $0x100] sm:$0xff]   ;;  %v3497_v36 = vld [vmem:[%s5155_s0 + $0x108] sm:$0xff]   ;;  %v3498_v37 = vld [vmem:[%s5155_s0 + $0x110] sm:$0xff]  }
  0x3f   :  { %3200 = vmatprep.mubr.msk.bf16.mxu0 %vm498_vm0, %v3480_v17  ;;  %v3499_v38 = vld [vmem:[%s5155_s0 + $0x118] sm:$0xff]   ;;  %v3500_v39 = vld [vmem:[%s5155_s0 + $0x120] sm:$0xff]   ;;  %v3501_v40 = vld [vmem:[%s5155_s0 + $0x128] sm:$0xff]  }
  0x40   :  { %3299 = vmatpush3.bf16.msra.mxu1 %v3519_v26  ;;  %v3502_v41 = vld [vmem:[%s5155_s0 + $0x130] sm:$0xff]   ;;  %v3503_v42 = vld [vmem:[%s5155_s0 + $0x138] sm:$0xff]   ;;  %v3504_v43 = vld [vmem:[%s5155_s0 + $0x140] sm:$0xff]  }
  0x41   :  { %v3505_v44 = vld [vmem:[%s5155_s0 + $0x148] sm:$0xff]   ;;  %v3506_v45 = vld [vmem:[%s5155_s0 + $0x150] sm:$0xff]   ;;  %v3507_v46 = vld [vmem:[%s5155_s0 + $0x158] sm:$0xff]  }
  0x42   :  { %v3508_v47 = vld [vmem:[%s5155_s0 + $0x160] sm:$0xff]   ;;  %v3509_v48 = vld [vmem:[%s5155_s0 + $0x168] sm:$0xff]   ;;  %v3510_v49 = vld [vmem:[%s5155_s0 + $0x170] sm:$0xff]  }
  0x43   :  { %v3511_v50 = vld [vmem:[%s5155_s0 + $0x178] sm:$0xff]   ;;  %v3512_v51 = vld [vmem:[%s5155_s0 + $0x180] sm:$0xff]   ;;  %v3513_v52 = vld [vmem:[%s5155_s0 + $0x188] sm:$0xff]  }
  0x44   :  { %v3514_v53 = vld [vmem:[%s5155_s0 + $0x190] sm:$0xff]   ;;  %v4325_v55 = vld [vmem:[%s5157_s2] ss:$0 sm:$0xff]  ;;  %v3515_v59 = vld [vmem:[%s5155_s0 + $0x198] sm:$0xff]  }
  0x45   :  { %v3517_v61 = vld [vmem:[%s5155_s0 + $0x1a0] sm:$0xff]   ;;  %v3518_v5 = vld [vmem:[%s5155_s0 + $0x1a8] sm:$0xff]   ;;  %v3520_v7 = vld [vmem:[%s5155_s0 + $0x1b0] sm:$0xff]  }
  0x46   :  { %3201 = vmatmul.mubr.msk.bf16.gmra.mxu0 %vm498_vm0, %v3481_v18  ;;  %v3521_v16 = vld [vmem:[%s5155_s0 + $0x1b8] sm:$0xff]  }
  0x47   :  { %3204 = vmatprep.mubr.msk.bf16.mxu0 %vm498_vm0, %v3482_v19  ;;  %v3522_v19 = vld [vmem:[%s5155_s0 + $0x1c0] sm:$0xff]  }
  0x4e   :  { %3205 = vmatmul.mubr.msk.bf16.gmra.mxu0 %vm498_vm0, %v3483_v20 }
  0x4f   :  { %3208 = vmatprep.mubr.msk.bf16.mxu0 %vm498_vm0, %v3484_v21 }
  0x56   :  { %3209 = vmatmul.mubr.msk.bf16.gmra.mxu0 %vm498_vm0, %v3485_v22 }
  0x57   :  { %3212 = vmatprep.mubr.msk.bf16.mxu0 %vm498_vm0, %v3486_v23 }
  0x5e   :  { %3213 = vmatmul.mubr.msk.bf16.gmra.mxu0 %vm498_vm0, %v3487_v25 }
  0x5f   :  { %3216 = vmatprep.mubr.msk.bf16.mxu0 %vm498_vm0, %v3488_v27 }
  0x66   :  { %3217 = vmatmul.mubr.msk.bf16.gmra.mxu0 %vm498_vm0, %v3489_v28 }
  0x67   :  { %3220 = vmatprep.mubr.msk.bf16.mxu0 %vm498_vm0, %v3490_v29 }
  0x6e   :  { %3221 = vmatmul.mubr.msk.bf16.gmra.mxu0 %vm498_vm0, %v3491_v30 }
  0x6f   :  { %3224 = vmatprep.mubr.msk.bf16.mxu0 %vm498_vm0, %v3492_v31 }
  0x76   :  { %3225 = vmatmul.mubr.msk.bf16.gmra.mxu0 %vm498_vm0, %v3493_v32  ;;  %v3523_v32 = vld [vmem:[%s5155_s0 + $0x1c8] sm:$0xff]  }
  0x77   :  { %3228 = vmatprep.mubr.msk.bf16.mxu0 %vm498_vm0, %v3494_v33 }
  0x7e   :  { %3229 = vmatmul.mubr.msk.bf16.gmra.mxu0 %vm498_vm0, %v3495_v34 }
  0x7f   :  { %3232 = vmatprep.mubr.msk.bf16.mxu0 %vm498_vm0, %v3496_v35  ;;  %v3524_v35 = vld [vmem:[%s5155_s0 + $0x1d0] sm:$0xff]  }
  0x86   :  { %3233 = vmatmul.mubr.msk.bf16.gmra.mxu0 %vm498_vm0, %v3497_v36 }
  0x87   :  { %3236 = vmatprep.mubr.msk.bf16.mxu0 %vm498_vm0, %v3498_v37 }
  0x8e   :  { %3237 = vmatmul.mubr.msk.bf16.gmra.mxu0 %vm498_vm0, %v3499_v38 }
  0x8f   :  { %3240 = vmatprep.mubr.msk.bf16.mxu0 %vm498_vm0, %v3500_v39 }
  0x96   :  { %3241 = vmatmul.mubr.msk.bf16.gmra.mxu0 %vm498_vm0, %v3501_v40 }
  0x97   :  { %3244 = vmatprep.mubr.msk.bf16.mxu0 %vm498_vm0, %v3502_v41 }
  0x9e   :  { %3245 = vmatmul.mubr.msk.bf16.gmra.mxu0 %vm498_vm0, %v3503_v42 }
  0x9f   :  { %3248 = vmatprep.mubr.msk.bf16.mxu0 %vm498_vm0, %v3504_v43 }
  0xa6   :  { %3249 = vmatmul.mubr.msk.bf16.gmra.mxu0 %vm498_vm0, %v3505_v44 }
  0xa7   :  { %3252 = vmatprep.mubr.msk.bf16.mxu0 %vm498_vm0, %v3506_v45 }
  0xae   :  { %3253 = vmatmul.mubr.msk.bf16.gmra.mxu0 %vm498_vm0, %v3507_v46 }
  0xaf   :  { %3256 = vmatprep.mubr.msk.bf16.mxu0 %vm498_vm0, %v3508_v47 }
  0xb6   :  { %3257 = vmatmul.mubr.msk.bf16.gmra.mxu0 %vm498_vm0, %v3509_v48  ;;  %v3525_v48 = vld [vmem:[%s5155_s0 + $0x1d8] sm:$0xff]  }
  0xb7   :  { %3260 = vmatprep.mubr.msk.bf16.mxu0 %vm498_vm0, %v3510_v49 }
  0xbe   :  { %3261 = vmatmul.mubr.msk.bf16.gmra.mxu0 %vm498_vm0, %v3511_v50 }
  0xbf   :  { %3264 = vmatprep.mubr.msk.bf16.mxu0 %vm498_vm0, %v3512_v51  ;;  %v3526_v51 = vld [vmem:[%s5155_s0 + $0x1e0] sm:$0xff]  }
  0xc6   :  { %v3170_v54 = vpop.f32.mrf.mxu0  ;;  %3265 = vmatmul.mubr.msk.bf16.gmra.mxu0 %vm498_vm0, %v3513_v52 }
  0xc7   :  { %3268 = vmatprep.mubr.msk.bf16.mxu0 %vm498_vm0, %v3514_v53  ;;  %v734_v62 = vadd.f32 %v3170_v54, %v4325_v55 }
  0xc8   :  { %v725_v56 = vpop.f32.mrf.mxu0 }
  0xc9   :  { %v726_v57 = vadd.f32 %v4325_v55, %v725_v56 }
  0xca   :  { %v3171_v58 = vpop.f32.mrf.mxu0 }
  0xcb   :  { %v737_v60 = vadd.f32 %v3171_v58, %v4325_v55  ;;  %3530 = vtanh.f32 %v726_v57 }
  0xcc   :  { %v728_v63 = vpop.f32.mrf.mxu0 }
  0xcd   :  { %v729_v0 = vadd.f32 %v4325_v55, %v728_v63  ;;  %3532 = vtanh.f32 %v737_v60 }
  0xce   :  { %v3174_v1 = vpop.f32.mrf.mxu0  ;;  %3269 = vmatmul.mubr.msk.bf16.gmra.mxu0 %vm498_vm0, %v3515_v59 }
  0xcf   :  { %3534 = vtanh.f32 %v729_v0  ;;  %3272 = vmatprep.mubr.msk.bf16.mxu0 %vm498_vm0, %v3517_v61  ;;  %v750_v8 = vadd.f32 %v3174_v1, %v4325_v55  ;;  %v3527_v1 = vld [vmem:[%s5155_s0 + $0x1e8] sm:$0xff]  }
  0xd0   :  { %3536 = vtanh.f32 %v734_v62  ;;  %v741_v2 = vpop.f32.mrf.mxu0 }
  0xd1   :  { %v742_v3 = vadd.f32 %v4325_v55, %v741_v2 }
  0xd2   :  { %v3175_v4 = vpop.f32.mrf.mxu0 }
  0xd3   :  { %v753_v6 = vadd.f32 %v3175_v4, %v4325_v55  ;;  %3538 = vtanh.f32 %v742_v3  ;;  %v3528_v4 = vld [vmem:[%s5155_s0 + $0x1f0] sm:$0xff]  }
  0xd4   :  { %v744_v9 = vpop.f32.mrf.mxu0 }
  0xd5   :  { %v745_v10 = vadd.f32 %v4325_v55, %v744_v9  ;;  %3540 = vtanh.f32 %v753_v6 }
  0xd6   :  { %v3178_v11 = vpop.f32.mrf.mxu0  ;;  %3273 = vmatmul.mubr.msk.bf16.gmra.mxu0 %vm498_vm0, %v3518_v5 }
  0xd7   :  { %3542 = vtanh.f32 %v745_v10  ;;  %3276 = vmatprep.mubr.msk.bf16.mxu0 %vm498_vm0, %v3520_v7  ;;  %v766_v21 = vadd.f32 %v3178_v11, %v4325_v55 }
  0xd8   :  { %3544 = vtanh.f32 %v750_v8  ;;  %v757_v12 = vpop.f32.mrf.mxu0  ;;  %v3531_v14 = vpop.eup %3530 }
  0xd9   :  { %v758_v13 = vadd.f32 %v4325_v55, %v757_v12 }
  0xda   :  { %v3179_v15 = vpop.f32.mrf.mxu0  ;;  %v3533_v17 = vpop.eup %3532 }
  0xdb   :  { %v769_v18 = vadd.f32 %v3179_v15, %v4325_v55  ;;  %3546 = vtanh.f32 %v758_v13 }
  0xdc   :  { %v3535_v20 = vpop.eup %3534  ;;  %v760_v22 = vpop.f32.mrf.mxu0 }
  0xdd   :  { %v3537_v23 = vpop.eup %3536  ;;  %v761_v24 = vadd.f32 %v4325_v55, %v760_v22  ;;  %v1364_v25 = vpack.c.bf16 %v3535_v20, %v3531_v14  ;;  %3548 = vtanh.f32 %v769_v18 }
  0xde   :  { %v3182_v26 = vpop.f32.mrf.mxu0  ;;  %v1365_v27 = vpack.c.bf16 %v3533_v17, %v3537_v23  ;;  %3277 = vmatmul.mubr.msk.bf16.gmra.mxu0 %vm498_vm0, %v3521_v16  ;;  %v3529_v17 = vld [vmem:[%s5155_s0 + $0x1f8] sm:$0xff]  }
  0xdf   :  { %3550 = vtanh.f32 %v761_v24  ;;  %3300 = vmatprep.mubr.msk.bf16.mxu1 %vm1446_vm1, %v1364_v25  ;;  %3280 = vmatprep.mubr.msk.bf16.mxu0 %vm498_vm0, %v3522_v19  ;;  %v782_v37 = vadd.f32 %v3182_v26, %v4325_v55 }
  0xe0   :  { %3552 = vtanh.f32 %v766_v21  ;;  %v773_v28 = vpop.f32.mrf.mxu0  ;;  %3301 = vmatmul.mubr.msk.bf16.vlgmr.msra.gmra.mxu1 %vm1446_vm1, %v1365_v27  ;;  %v3539_v30 = vpop.eup %3538 }
  0xe1   :  { %v774_v29 = vadd.f32 %v4325_v55, %v773_v28 }
  0xe2   :  { %v3183_v31 = vpop.f32.mrf.mxu0  ;;  %v3541_v33 = vpop.eup %3540 }
  0xe3   :  { %v785_v34 = vadd.f32 %v3183_v31, %v4325_v55  ;;  %3554 = vtanh.f32 %v774_v29 }
  0xe4   :  { %v3543_v36 = vpop.eup %3542  ;;  %v776_v38 = vpop.f32.mrf.mxu0 }
  0xe5   :  { %v3545_v39 = vpop.eup %3544  ;;  %v777_v40 = vadd.f32 %v4325_v55, %v776_v38  ;;  %v1366_v41 = vpack.c.bf16 %v3543_v36, %v3539_v30  ;;  %3556 = vtanh.f32 %v785_v34 }
  0xe6   :  { %v3186_v42 = vpop.f32.mrf.mxu0  ;;  %v1367_v43 = vpack.c.bf16 %v3541_v33, %v3545_v39  ;;  %3281 = vmatmul.mubr.msk.bf16.gmra.mxu0 %vm498_vm0, %v3523_v32 }
  0xe7   :  { %3558 = vtanh.f32 %v777_v40  ;;  %3304 = vmatprep.mubr.msk.bf16.mxu1 %vm1446_vm1, %v1366_v41  ;;  %3284 = vmatprep.mubr.msk.bf16.mxu0 %vm498_vm0, %v3524_v35  ;;  %v798_v53 = vadd.f32 %v3186_v42, %v4325_v55 }
  0xe8   :  { %3560 = vtanh.f32 %v782_v37  ;;  %v789_v44 = vpop.f32.mrf.mxu0  ;;  %3305 = vmatmul.mubr.msk.bf16.gmra.mxu1 %vm1446_vm1, %v1367_v43  ;;  %v3547_v46 = vpop.eup %3546 }
  0xe9   :  { %v790_v45 = vadd.f32 %v4325_v55, %v789_v44 }
  0xea   :  { %v3187_v47 = vpop.f32.mrf.mxu0  ;;  %v3549_v49 = vpop.eup %3548 }
  0xeb   :  { %v801_v50 = vadd.f32 %v3187_v47, %v4325_v55  ;;  %3562 = vtanh.f32 %v790_v45 }
  0xec   :  { %v3551_v52 = vpop.eup %3550  ;;  %v792_v54 = vpop.f32.mrf.mxu0 }
  0xed   :  { %v3553_v56 = vpop.eup %3552  ;;  %v793_v57 = vadd.f32 %v4325_v55, %v792_v54  ;;  %v1368_v58 = vpack.c.bf16 %v3551_v52, %v3547_v46  ;;  %3564 = vtanh.f32 %v801_v50 }
  0xee   :  { %v3190_v59 = vpop.f32.mrf.mxu0  ;;  %v1369_v60 = vpack.c.bf16 %v3549_v49, %v3553_v56  ;;  %3285 = vmatmul.mubr.msk.bf16.gmra.mxu0 %vm498_vm0, %v3525_v48 }
  0xef   :  { %3566 = vtanh.f32 %v793_v57  ;;  %3308 = vmatprep.mubr.msk.bf16.mxu1 %vm1446_vm1, %v1368_v58  ;;  %3288 = vmatprep.mubr.msk.bf16.mxu0 %vm498_vm0, %v3526_v51  ;;  %v814_v6 = vadd.f32 %v3190_v59, %v4325_v55 }
  0xf0   :  { %3568 = vtanh.f32 %v798_v53  ;;  %v805_v61 = vpop.f32.mrf.mxu0  ;;  %3309 = vmatmul.mubr.msk.bf16.gmra.mxu1 %vm1446_vm1, %v1369_v60  ;;  %v3555_v63 = vpop.eup %3554 }
  0xf1   :  { %v806_v62 = vadd.f32 %v4325_v55, %v805_v61 }
  0xf2   :  { %v3191_v0 = vpop.f32.mrf.mxu0  ;;  %v3557_v2 = vpop.eup %3556 }
  0xf3   :  { %v817_v3 = vadd.f32 %v3191_v0, %v4325_v55  ;;  %3570 = vtanh.f32 %v806_v62 }
  0xf4   :  { %v3559_v5 = vpop.eup %3558  ;;  %v808_v7 = vpop.f32.mrf.mxu0 }
  0xf5   :  { %v3561_v8 = vpop.eup %3560  ;;  %v809_v9 = vadd.f32 %v4325_v55, %v808_v7  ;;  %v1370_v10 = vpack.c.bf16 %v3559_v5, %v3555_v63  ;;  %3572 = vtanh.f32 %v817_v3 }
  0xf6   :  { %v3194_v11 = vpop.f32.mrf.mxu0  ;;  %v1371_v12 = vpack.c.bf16 %v3557_v2, %v3561_v8  ;;  %3289 = vmatmul.mubr.msk.bf16.gmra.mxu0 %vm498_vm0, %v3527_v1 }
  0xf7   :  { %3574 = vtanh.f32 %v809_v9  ;;  %3312 = vmatprep.mubr.msk.bf16.mxu1 %vm1446_vm1, %v1370_v10  ;;  %3292 = vmatprep.mubr.msk.bf16.mxu0 %vm498_vm0, %v3528_v4  ;;  %v830_v21 = vadd.f32 %v3194_v11, %v4325_v55 }
  0xf8   :  { %3576 = vtanh.f32 %v814_v6  ;;  %v821_v13 = vpop.f32.mrf.mxu0  ;;  %3313 = vmatmul.mubr.msk.bf16.gmra.mxu1 %vm1446_vm1, %v1371_v12  ;;  %v3563_v15 = vpop.eup %3562 }
  0xf9   :  { %v822_v14 = vadd.f32 %v4325_v55, %v821_v13 }
  0xfa   :  { %v3195_v16 = vpop.f32.mrf.mxu0  ;;  %v3565_v18 = vpop.eup %3564 }
  0xfb   :  { %v833_v19 = vadd.f32 %v3195_v16, %v4325_v55  ;;  %3578 = vtanh.f32 %v822_v14 }
  0xfc   :  { %v3567_v20 = vpop.eup %3566  ;;  %v824_v22 = vpop.f32.mrf.mxu0 }
  0xfd   :  { %v3569_v23 = vpop.eup %3568  ;;  %v825_v24 = vadd.f32 %v4325_v55, %v824_v22  ;;  %v1372_v25 = vpack.c.bf16 %v3567_v20, %v3563_v15  ;;  %3580 = vtanh.f32 %v833_v19 }
  0xfe   :  { %v3198_v26 = vpop.f32.mrf.mxu0  ;;  %v1373_v27 = vpack.c.bf16 %v3565_v18, %v3569_v23  ;;  %3293 = vmatmul.mubr.msk.bf16.gmra.mxu0 %vm498_vm0, %v3529_v17 }
  0xff   :  { %3582 = vtanh.f32 %v825_v24  ;;  %3316 = vmatprep.mubr.msk.bf16.mxu1 %vm1446_vm1, %v1372_v25  ;;  %v846_v35 = vadd.f32 %v3198_v26, %v4325_v55 }
 0x100   :  { %3584 = vtanh.f32 %v830_v21  ;;  %v837_v28 = vpop.f32.mrf.mxu0  ;;  %3317 = vmatmul.mubr.msk.bf16.gmra.mxu1 %vm1446_vm1, %v1373_v27  ;;  %v3571_v30 = vpop.eup %3570 }
 0x101   :  { %v838_v29 = vadd.f32 %v4325_v55, %v837_v28 }
 0x102   :  { %v3199_v31 = vpop.f32.mrf.mxu0  ;;  %v3573_v32 = vpop.eup %3572 }
 0x103   :  { %v849_v33 = vadd.f32 %v3199_v31, %v4325_v55  ;;  %3586 = vtanh.f32 %v838_v29 }
 0x104   :  { %v3575_v34 = vpop.eup %3574  ;;  %v840_v36 = vpop.f32.mrf.mxu0 }
 0x105   :  { %v3577_v37 = vpop.eup %3576  ;;  %v841_v38 = vadd.f32 %v4325_v55, %v840_v36  ;;  %v1374_v39 = vpack.c.bf16 %v3575_v34, %v3571_v30  ;;  %3588 = vtanh.f32 %v849_v33 }
 0x106   :  { %v3202_v40 = vpop.f32.mrf.mxu0  ;;  %v1375_v41 = vpack.c.bf16 %v3573_v32, %v3577_v37 }
 0x107   :  { %3590 = vtanh.f32 %v841_v38  ;;  %3320 = vmatprep.mubr.msk.bf16.mxu1 %vm1446_vm1, %v1374_v39  ;;  %v862_v49 = vadd.f32 %v3202_v40, %v4325_v55 }
 0x108   :  { %3592 = vtanh.f32 %v846_v35  ;;  %v853_v42 = vpop.f32.mrf.mxu0  ;;  %3321 = vmatmul.mubr.msk.bf16.gmra.mxu1 %vm1446_vm1, %v1375_v41  ;;  %v3579_v44 = vpop.eup %3578 }
 0x109   :  { %v854_v43 = vadd.f32 %v4325_v55, %v853_v42 }
 0x10a   :  { %v3203_v45 = vpop.f32.mrf.mxu0  ;;  %v3581_v46 = vpop.eup %3580 }
 0x10b   :  { %v865_v47 = vadd.f32 %v3203_v45, %v4325_v55  ;;  %3594 = vtanh.f32 %v854_v43 }
 0x10c   :  { %v3583_v48 = vpop.eup %3582  ;;  %v856_v50 = vpop.f32.mrf.mxu0 }
 0x10d   :  { %v3585_v51 = vpop.eup %3584  ;;  %v857_v52 = vadd.f32 %v4325_v55, %v856_v50  ;;  %v1376_v53 = vpack.c.bf16 %v3583_v48, %v3579_v44  ;;  %3596 = vtanh.f32 %v865_v47 }
 0x10e   :  { %v3206_v54 = vpop.f32.mrf.mxu0  ;;  %v1377_v56 = vpack.c.bf16 %v3581_v46, %v3585_v51 }
 0x10f   :  { %3598 = vtanh.f32 %v857_v52  ;;  %3324 = vmatprep.mubr.msk.bf16.mxu1 %vm1446_vm1, %v1376_v53  ;;  %v878_v0 = vadd.f32 %v3206_v54, %v4325_v55 }
 0x110   :  { %3600 = vtanh.f32 %v862_v49  ;;  %v869_v57 = vpop.f32.mrf.mxu0  ;;  %3325 = vmatmul.mubr.msk.bf16.gmra.mxu1 %vm1446_vm1, %v1377_v56  ;;  %v3587_v59 = vpop.eup %3586 }
 0x111   :  { %v870_v58 = vadd.f32 %v4325_v55, %v869_v57 }
 0x112   :  { %v3207_v60 = vpop.f32.mrf.mxu0  ;;  %v3589_v61 = vpop.eup %3588 }
 0x113   :  { %v881_v62 = vadd.f32 %v3207_v60, %v4325_v55  ;;  %3602 = vtanh.f32 %v870_v58 }
 0x114   :  { %v3591_v63 = vpop.eup %3590  ;;  %v872_v1 = vpop.f32.mrf.mxu0 }
 0x115   :  { %v3593_v2 = vpop.eup %3592  ;;  %v873_v3 = vadd.f32 %v4325_v55, %v872_v1  ;;  %v1378_v4 = vpack.c.bf16 %v3591_v63, %v3587_v59  ;;  %3604 = vtanh.f32 %v881_v62 }
 0x116   :  { %v3210_v5 = vpop.f32.mrf.mxu0  ;;  %v1379_v6 = vpack.c.bf16 %v3589_v61, %v3593_v2 }
 0x117   :  { %3606 = vtanh.f32 %v873_v3  ;;  %3328 = vmatprep.mubr.msk.bf16.mxu1 %vm1446_vm1, %v1378_v4  ;;  %v894_v14 = vadd.f32 %v3210_v5, %v4325_v55 }
 0x118   :  { %3608 = vtanh.f32 %v878_v0  ;;  %v885_v7 = vpop.f32.mrf.mxu0  ;;  %3329 = vmatmul.mubr.msk.bf16.gmra.mxu1 %vm1446_vm1, %v1379_v6  ;;  %v3595_v9 = vpop.eup %3594 }
 0x119   :  { %v886_v8 = vadd.f32 %v4325_v55, %v885_v7 }
 0x11a   :  { %v3211_v10 = vpop.f32.mrf.mxu0  ;;  %v3597_v11 = vpop.eup %3596 }
 0x11b   :  { %v897_v12 = vadd.f32 %v3211_v10, %v4325_v55  ;;  %3610 = vtanh.f32 %v886_v8 }
 0x11c   :  { %v3599_v13 = vpop.eup %3598  ;;  %v888_v15 = vpop.f32.mrf.mxu0 }
 0x11d   :  { %v3601_v16 = vpop.eup %3600  ;;  %v889_v17 = vadd.f32 %v4325_v55, %v888_v15  ;;  %v1380_v18 = vpack.c.bf16 %v3599_v13, %v3595_v9  ;;  %3612 = vtanh.f32 %v897_v12 }
 0x11e   :  { %v3214_v19 = vpop.f32.mrf.mxu0  ;;  %v1381_v20 = vpack.c.bf16 %v3597_v11, %v3601_v16 }
 0x11f   :  { %3614 = vtanh.f32 %v889_v17  ;;  %3332 = vmatprep.mubr.msk.bf16.mxu1 %vm1446_vm1, %v1380_v18  ;;  %v910_v28 = vadd.f32 %v3214_v19, %v4325_v55 }
 0x120   :  { %3616 = vtanh.f32 %v894_v14  ;;  %v901_v21 = vpop.f32.mrf.mxu0  ;;  %3333 = vmatmul.mubr.msk.bf16.gmra.mxu1 %vm1446_vm1, %v1381_v20  ;;  %v3603_v23 = vpop.eup %3602 }
 0x121   :  { %v902_v22 = vadd.f32 %v4325_v55, %v901_v21 }
 0x122   :  { %v3215_v24 = vpop.f32.mrf.mxu0  ;;  %v3605_v25 = vpop.eup %3604 }
 0x123   :  { %v913_v26 = vadd.f32 %v3215_v24, %v4325_v55  ;;  %3618 = vtanh.f32 %v902_v22 }
 0x124   :  { %v3607_v27 = vpop.eup %3606  ;;  %v904_v29 = vpop.f32.mrf.mxu0 }
 0x125   :  { %v3609_v30 = vpop.eup %3608  ;;  %v905_v31 = vadd.f32 %v4325_v55, %v904_v29  ;;  %v1382_v32 = vpack.c.bf16 %v3607_v27, %v3603_v23  ;;  %3620 = vtanh.f32 %v913_v26 }
 0x126   :  { %v3218_v33 = vpop.f32.mrf.mxu0  ;;  %v1383_v34 = vpack.c.bf16 %v3605_v25, %v3609_v30 }
 0x127   :  { %3622 = vtanh.f32 %v905_v31  ;;  %3336 = vmatprep.mubr.msk.bf16.mxu1 %vm1446_vm1, %v1382_v32  ;;  %v926_v42 = vadd.f32 %v3218_v33, %v4325_v55 }
 0x128   :  { %3624 = vtanh.f32 %v910_v28  ;;  %v917_v35 = vpop.f32.mrf.mxu0  ;;  %3337 = vmatmul.mubr.msk.bf16.gmra.mxu1 %vm1446_vm1, %v1383_v34  ;;  %v3611_v37 = vpop.eup %3610 }
 0x129   :  { %v918_v36 = vadd.f32 %v4325_v55, %v917_v35 }
 0x12a   :  { %v3219_v38 = vpop.f32.mrf.mxu0  ;;  %v3613_v39 = vpop.eup %3612 }
 0x12b   :  { %v929_v40 = vadd.f32 %v3219_v38, %v4325_v55  ;;  %3626 = vtanh.f32 %v918_v36 }
 0x12c   :  { %v3615_v41 = vpop.eup %3614  ;;  %v920_v43 = vpop.f32.mrf.mxu0 }
 0x12d   :  { %v3617_v44 = vpop.eup %3616  ;;  %v921_v45 = vadd.f32 %v4325_v55, %v920_v43  ;;  %v1384_v46 = vpack.c.bf16 %v3615_v41, %v3611_v37  ;;  %3628 = vtanh.f32 %v929_v40 }
 0x12e   :  { %v3222_v47 = vpop.f32.mrf.mxu0  ;;  %v1385_v48 = vpack.c.bf16 %v3613_v39, %v3617_v44 }
 0x12f   :  { %3630 = vtanh.f32 %v921_v45  ;;  %3340 = vmatprep.mubr.msk.bf16.mxu1 %vm1446_vm1, %v1384_v46  ;;  %v942_v57 = vadd.f32 %v3222_v47, %v4325_v55 }
 0x130   :  { %3632 = vtanh.f32 %v926_v42  ;;  %v933_v49 = vpop.f32.mrf.mxu0  ;;  %3341 = vmatmul.mubr.msk.bf16.gmra.mxu1 %vm1446_vm1, %v1385_v48  ;;  %v3619_v51 = vpop.eup %3618 }
 0x131   :  { %v934_v50 = vadd.f32 %v4325_v55, %v933_v49 }
 0x132   :  { %v3223_v52 = vpop.f32.mrf.mxu0  ;;  %v3621_v53 = vpop.eup %3620 }
 0x133   :  { %v945_v54 = vadd.f32 %v3223_v52, %v4325_v55  ;;  %3634 = vtanh.f32 %v934_v50 }
 0x134   :  { %v3623_v56 = vpop.eup %3622  ;;  %v936_v58 = vpop.f32.mrf.mxu0 }
 0x135   :  { %v3625_v59 = vpop.eup %3624  ;;  %v937_v60 = vadd.f32 %v4325_v55, %v936_v58  ;;  %v1386_v61 = vpack.c.bf16 %v3623_v56, %v3619_v51  ;;  %3636 = vtanh.f32 %v945_v54 }
 0x136   :  { %v3226_v62 = vpop.f32.mrf.mxu0  ;;  %v1387_v63 = vpack.c.bf16 %v3621_v53, %v3625_v59 }
 0x137   :  { %3638 = vtanh.f32 %v937_v60  ;;  %3344 = vmatprep.mubr.msk.bf16.mxu1 %vm1446_vm1, %v1386_v61  ;;  %v958_v7 = vadd.f32 %v3226_v62, %v4325_v55 }
 0x138   :  { %3640 = vtanh.f32 %v942_v57  ;;  %v949_v0 = vpop.f32.mrf.mxu0  ;;  %3345 = vmatmul.mubr.msk.bf16.gmra.mxu1 %vm1446_vm1, %v1387_v63  ;;  %v3627_v2 = vpop.eup %3626 }
 0x139   :  { %v950_v1 = vadd.f32 %v4325_v55, %v949_v0 }
 0x13a   :  { %v3227_v3 = vpop.f32.mrf.mxu0  ;;  %v3629_v4 = vpop.eup %3628 }
 0x13b   :  { %v961_v5 = vadd.f32 %v3227_v3, %v4325_v55  ;;  %3642 = vtanh.f32 %v950_v1 }
 0x13c   :  { %v3631_v6 = vpop.eup %3630  ;;  %v952_v8 = vpop.f32.mrf.mxu0 }
 0x13d   :  { %v3633_v9 = vpop.eup %3632  ;;  %v953_v10 = vadd.f32 %v4325_v55, %v952_v8  ;;  %v1388_v11 = vpack.c.bf16 %v3631_v6, %v3627_v2  ;;  %3644 = vtanh.f32 %v961_v5 }
 0x13e   :  { %v3230_v12 = vpop.f32.mrf.mxu0  ;;  %v1389_v13 = vpack.c.bf16 %v3629_v4, %v3633_v9 }
 0x13f   :  { %3646 = vtanh.f32 %v953_v10  ;;  %3348 = vmatprep.mubr.msk.bf16.mxu1 %vm1446_vm1, %v1388_v11  ;;  %v974_v21 = vadd.f32 %v3230_v12, %v4325_v55 }
 0x140   :  { %3648 = vtanh.f32 %v958_v7  ;;  %v965_v14 = vpop.f32.mrf.mxu0  ;;  %3349 = vmatmul.mubr.msk.bf16.gmra.mxu1 %vm1446_vm1, %v1389_v13  ;;  %v3635_v16 = vpop.eup %3634 }
 0x141   :  { %v966_v15 = vadd.f32 %v4325_v55, %v965_v14 }
 0x142   :  { %v3231_v17 = vpop.f32.mrf.mxu0  ;;  %v3637_v18 = vpop.eup %3636 }
 0x143   :  { %v977_v19 = vadd.f32 %v3231_v17, %v4325_v55  ;;  %3650 = vtanh.f32 %v966_v15 }
 0x144   :  { %v3639_v20 = vpop.eup %3638  ;;  %v968_v22 = vpop.f32.mrf.mxu0 }
 0x145   :  { %v3641_v23 = vpop.eup %3640  ;;  %v969_v24 = vadd.f32 %v4325_v55, %v968_v22  ;;  %v1390_v25 = vpack.c.bf16 %v3639_v20, %v3635_v16  ;;  %3652 = vtanh.f32 %v977_v19 }
 0x146   :  { %v1391_v26 = vpack.c.bf16 %v3637_v18, %v3641_v23  ;;  %v3234_v27 = vpop.f32.mrf.mxu0 }
 0x147   :  { %3654 = vtanh.f32 %v969_v24  ;;  %3352 = vmatprep.mubr.msk.bf16.mxu1 %vm1446_vm1, %v1390_v25  ;;  %v990_v35 = vadd.f32 %v3234_v27, %v4325_v55 }
 0x148   :  { %3656 = vtanh.f32 %v974_v21  ;;  %3353 = vmatmul.mubr.msk.bf16.gmra.mxu1 %vm1446_vm1, %v1391_v26  ;;  %v981_v28 = vpop.f32.mrf.mxu0  ;;  %v3643_v30 = vpop.eup %3642 }
 0x149   :  { %v982_v29 = vadd.f32 %v4325_v55, %v981_v28 }
 0x14a   :  { %v3235_v31 = vpop.f32.mrf.mxu0  ;;  %v3645_v32 = vpop.eup %3644 }
 0x14b   :  { %v993_v33 = vadd.f32 %v3235_v31, %v4325_v55  ;;  %3658 = vtanh.f32 %v982_v29 }
 0x14c   :  { %v3647_v34 = vpop.eup %3646  ;;  %v984_v36 = vpop.f32.mrf.mxu0 }
 0x14d   :  { %v3649_v37 = vpop.eup %3648  ;;  %v1392_v38 = vpack.c.bf16 %v3647_v34, %v3643_v30  ;;  %v985_v39 = vadd.f32 %v4325_v55, %v984_v36  ;;  %3660 = vtanh.f32 %v993_v33 }
 0x14e   :  { %v1393_v40 = vpack.c.bf16 %v3645_v32, %v3649_v37  ;;  %v3238_v41 = vpop.f32.mrf.mxu0 }
 0x14f   :  { %3356 = vmatprep.mubr.msk.bf16.mxu1 %vm1446_vm1, %v1392_v38  ;;  %3662 = vtanh.f32 %v985_v39  ;;  %v1006_v49 = vadd.f32 %v3238_v41, %v4325_v55 }
 0x150   :  { %3664 = vtanh.f32 %v990_v35  ;;  %3357 = vmatmul.mubr.msk.bf16.gmra.mxu1 %vm1446_vm1, %v1393_v40  ;;  %v997_v42 = vpop.f32.mrf.mxu0  ;;  %v3651_v44 = vpop.eup %3650 }
 0x151   :  { %v998_v43 = vadd.f32 %v4325_v55, %v997_v42 }
 0x152   :  { %v3239_v45 = vpop.f32.mrf.mxu0  ;;  %v3653_v46 = vpop.eup %3652 }
 0x153   :  { %v1009_v47 = vadd.f32 %v3239_v45, %v4325_v55  ;;  %3666 = vtanh.f32 %v998_v43 }
 0x154   :  { %v3655_v48 = vpop.eup %3654  ;;  %v1000_v50 = vpop.f32.mrf.mxu0 }
 0x155   :  { %v3657_v51 = vpop.eup %3656  ;;  %v1394_v52 = vpack.c.bf16 %v3655_v48, %v3651_v44  ;;  %v1001_v53 = vadd.f32 %v4325_v55, %v1000_v50  ;;  %3668 = vtanh.f32 %v1009_v47 }
 0x156   :  { %v1395_v54 = vpack.c.bf16 %v3653_v46, %v3657_v51  ;;  %v3242_v56 = vpop.f32.mrf.mxu0 }
 0x157   :  { %3360 = vmatprep.mubr.msk.bf16.mxu1 %vm1446_vm1, %v1394_v52  ;;  %3670 = vtanh.f32 %v1001_v53  ;;  %v1022_v0 = vadd.f32 %v3242_v56, %v4325_v55 }
 0x158   :  { %3672 = vtanh.f32 %v1006_v49  ;;  %3361 = vmatmul.mubr.msk.bf16.gmra.mxu1 %vm1446_vm1, %v1395_v54  ;;  %v1013_v57 = vpop.f32.mrf.mxu0  ;;  %v3659_v59 = vpop.eup %3658 }
 0x159   :  { %v1014_v58 = vadd.f32 %v4325_v55, %v1013_v57 }
 0x15a   :  { %v3243_v60 = vpop.f32.mrf.mxu0  ;;  %v3661_v61 = vpop.eup %3660 }
 0x15b   :  { %v1025_v62 = vadd.f32 %v3243_v60, %v4325_v55  ;;  %3674 = vtanh.f32 %v1014_v58 }
 0x15c   :  { %v3663_v63 = vpop.eup %3662  ;;  %v1016_v1 = vpop.f32.mrf.mxu0 }
 0x15d   :  { %v3665_v2 = vpop.eup %3664  ;;  %v1017_v3 = vadd.f32 %v4325_v55, %v1016_v1  ;;  %v1396_v4 = vpack.c.bf16 %v3663_v63, %v3659_v59  ;;  %3676 = vtanh.f32 %v1025_v62 }
 0x15e   :  { %v3246_v5 = vpop.f32.mrf.mxu0  ;;  %v1397_v6 = vpack.c.bf16 %v3661_v61, %v3665_v2 }
 0x15f   :  { %3678 = vtanh.f32 %v1017_v3  ;;  %3364 = vmatprep.mubr.msk.bf16.mxu1 %vm1446_vm1, %v1396_v4  ;;  %v1038_v14 = vadd.f32 %v3246_v5, %v4325_v55 }
 0x160   :  { %3680 = vtanh.f32 %v1022_v0  ;;  %v1029_v7 = vpop.f32.mrf.mxu0  ;;  %3365 = vmatmul.mubr.msk.bf16.gmra.mxu1 %vm1446_vm1, %v1397_v6  ;;  %v3667_v9 = vpop.eup %3666 }
 0x161   :  { %v1030_v8 = vadd.f32 %v4325_v55, %v1029_v7 }
 0x162   :  { %v3247_v10 = vpop.f32.mrf.mxu0  ;;  %v3669_v11 = vpop.eup %3668 }
 0x163   :  { %v1041_v12 = vadd.f32 %v3247_v10, %v4325_v55  ;;  %3682 = vtanh.f32 %v1030_v8 }
 0x164   :  { %v3671_v13 = vpop.eup %3670  ;;  %v1032_v15 = vpop.f32.mrf.mxu0 }
 0x165   :  { %v3673_v16 = vpop.eup %3672  ;;  %v1033_v17 = vadd.f32 %v4325_v55, %v1032_v15  ;;  %v1398_v18 = vpack.c.bf16 %v3671_v13, %v3667_v9  ;;  %3684 = vtanh.f32 %v1041_v12 }
 0x166   :  { %v3250_v19 = vpop.f32.mrf.mxu0  ;;  %v1399_v20 = vpack.c.bf16 %v3669_v11, %v3673_v16 }
 0x167   :  { %3686 = vtanh.f32 %v1033_v17  ;;  %3368 = vmatprep.mubr.msk.bf16.mxu1 %vm1446_vm1, %v1398_v18  ;;  %v1054_v28 = vadd.f32 %v3250_v19, %v4325_v55 }
 0x168   :  { %3688 = vtanh.f32 %v1038_v14  ;;  %v1045_v21 = vpop.f32.mrf.mxu0  ;;  %3369 = vmatmul.mubr.msk.bf16.gmra.mxu1 %vm1446_vm1, %v1399_v20  ;;  %v3675_v23 = vpop.eup %3674 }
 0x169   :  { %v1046_v22 = vadd.f32 %v4325_v55, %v1045_v21 }
 0x16a   :  { %v3251_v24 = vpop.f32.mrf.mxu0  ;;  %v3677_v25 = vpop.eup %3676 }
 0x16b   :  { %v1057_v26 = vadd.f32 %v3251_v24, %v4325_v55  ;;  %3690 = vtanh.f32 %v1046_v22 }
 0x16c   :  { %v3679_v27 = vpop.eup %3678  ;;  %v1048_v29 = vpop.f32.mrf.mxu0 }
 0x16d   :  { %v3681_v30 = vpop.eup %3680  ;;  %v1049_v31 = vadd.f32 %v4325_v55, %v1048_v29  ;;  %v1400_v32 = vpack.c.bf16 %v3679_v27, %v3675_v23  ;;  %3692 = vtanh.f32 %v1057_v26  ;;  %v4528_v29 = vld [vmem:[%s5157_s2] ss:$0 sm:$0xff] }
 0x16e   :  { %v3254_v33 = vpop.f32.mrf.mxu0  ;;  %v1401_v34 = vpack.c.bf16 %v3677_v25, %v3681_v30 }
 0x16f   :  { %3694 = vtanh.f32 %v1049_v31  ;;  %3372 = vmatprep.mubr.msk.bf16.mxu1 %vm1446_vm1, %v1400_v32  ;;  %v1070_v42 = vadd.f32 %v3254_v33, %v4325_v55 }
 0x170   :  { %3696 = vtanh.f32 %v1054_v28  ;;  %v1061_v35 = vpop.f32.mrf.mxu0  ;;  %3373 = vmatmul.mubr.msk.bf16.gmra.mxu1 %vm1446_vm1, %v1401_v34  ;;  %v3683_v37 = vpop.eup %3682 }
 0x171   :  { %v1062_v36 = vadd.f32 %v4325_v55, %v1061_v35 }
 0x172   :  { %v3255_v38 = vpop.f32.mrf.mxu0  ;;  %v3685_v39 = vpop.eup %3684 }
 0x173   :  { %v1073_v40 = vadd.f32 %v3255_v38, %v4325_v55  ;;  %3698 = vtanh.f32 %v1062_v36 }
 0x174   :  { %v3687_v41 = vpop.eup %3686  ;;  %v1064_v43 = vpop.f32.mrf.mxu0 }
 0x175   :  { %v3689_v44 = vpop.eup %3688  ;;  %v1065_v45 = vadd.f32 %v4325_v55, %v1064_v43  ;;  %v1402_v46 = vpack.c.bf16 %v3687_v41, %v3683_v37  ;;  %3700 = vtanh.f32 %v1073_v40 }
 0x176   :  { %v3258_v47 = vpop.f32.mrf.mxu0  ;;  %v1403_v48 = vpack.c.bf16 %v3685_v39, %v3689_v44 }
 0x177   :  { %3702 = vtanh.f32 %v1065_v45  ;;  %3376 = vmatprep.mubr.msk.bf16.mxu1 %vm1446_vm1, %v1402_v46  ;;  %v1086_v57 = vadd.f32 %v3258_v47, %v4325_v55 }
 0x178   :  { %3704 = vtanh.f32 %v1070_v42  ;;  %v1077_v49 = vpop.f32.mrf.mxu0  ;;  %3377 = vmatmul.mubr.msk.bf16.gmra.mxu1 %vm1446_vm1, %v1403_v48  ;;  %v3691_v51 = vpop.eup %3690 }
 0x179   :  { %v1078_v50 = vadd.f32 %v4325_v55, %v1077_v49 }
 0x17a   :  { %v3259_v52 = vpop.f32.mrf.mxu0  ;;  %v3693_v53 = vpop.eup %3692 }
 0x17b   :  { %v1089_v54 = vadd.f32 %v3259_v52, %v4325_v55  ;;  %3706 = vtanh.f32 %v1078_v50 }
 0x17c   :  { %v3695_v56 = vpop.eup %3694  ;;  %v1080_v58 = vpop.f32.mrf.mxu0 }
 0x17d   :  { %v3697_v59 = vpop.eup %3696  ;;  %v1081_v60 = vadd.f32 %v4325_v55, %v1080_v58  ;;  %v1404_v61 = vpack.c.bf16 %v3695_v56, %v3691_v51  ;;  %3708 = vtanh.f32 %v1089_v54  ;;  %v4543_v54 = vld [vmem:[%s5159_s4] ss:$0 sm:$0xff] }
 0x17e   :  { %v3262_v62 = vpop.f32.mrf.mxu0  ;;  %v1405_v63 = vpack.c.bf16 %v3693_v53, %v3697_v59 }
 0x17f   :  { %3710 = vtanh.f32 %v1081_v60  ;;  %3380 = vmatprep.mubr.msk.bf16.mxu1 %vm1446_vm1, %v1404_v61  ;;  %v1102_v7 = vadd.f32 %v3262_v62, %v4325_v55 }
 0x180   :  { %3712 = vtanh.f32 %v1086_v57  ;;  %v1093_v0 = vpop.f32.mrf.mxu0  ;;  %3381 = vmatmul.mubr.msk.bf16.gmra.mxu1 %vm1446_vm1, %v1405_v63  ;;  %v3699_v2 = vpop.eup %3698 }
 0x181   :  { %v1094_v1 = vadd.f32 %v4325_v55, %v1093_v0 }
 0x182   :  { %v3263_v3 = vpop.f32.mrf.mxu0  ;;  %v3701_v4 = vpop.eup %3700 }
 0x183   :  { %v1105_v5 = vadd.f32 %v3263_v3, %v4325_v55  ;;  %3714 = vtanh.f32 %v1094_v1 }
 0x184   :  { %v3703_v6 = vpop.eup %3702  ;;  %v1096_v8 = vpop.f32.mrf.mxu0 }
 0x185   :  { %v3705_v9 = vpop.eup %3704  ;;  %v1097_v10 = vadd.f32 %v4325_v55, %v1096_v8  ;;  %v1406_v11 = vpack.c.bf16 %v3703_v6, %v3699_v2  ;;  %3716 = vtanh.f32 %v1105_v5 }
 0x186   :  { %v3266_v12 = vpop.f32.mrf.mxu0  ;;  %v1407_v13 = vpack.c.bf16 %v3701_v4, %v3705_v9 }
 0x187   :  { %3718 = vtanh.f32 %v1097_v10  ;;  %3384 = vmatprep.mubr.msk.bf16.mxu1 %vm1446_vm1, %v1406_v11  ;;  %v1118_v21 = vadd.f32 %v3266_v12, %v4325_v55 }
 0x188   :  { %3720 = vtanh.f32 %v1102_v7  ;;  %v1109_v14 = vpop.f32.mrf.mxu0  ;;  %3385 = vmatmul.mubr.msk.bf16.gmra.mxu1 %vm1446_vm1, %v1407_v13  ;;  %v3707_v16 = vpop.eup %3706 }
 0x189   :  { %v1110_v15 = vadd.f32 %v4325_v55, %v1109_v14 }
 0x18a   :  { %v3267_v17 = vpop.f32.mrf.mxu0  ;;  %v3709_v18 = vpop.eup %3708 }
 0x18b   :  { %v1121_v19 = vadd.f32 %v3267_v17, %v4325_v55  ;;  %3722 = vtanh.f32 %v1110_v15 }
 0x18c   :  { %v3711_v20 = vpop.eup %3710  ;;  %v1112_v22 = vpop.f32.mrf.mxu0 }
 0x18d   :  { %v3713_v23 = vpop.eup %3712  ;;  %v1113_v24 = vadd.f32 %v4325_v55, %v1112_v22  ;;  %v1408_v25 = vpack.c.bf16 %v3711_v20, %v3707_v16  ;;  %3724 = vtanh.f32 %v1121_v19 }
 0x18e   :  { %v3270_v26 = vpop.f32.mrf.mxu0  ;;  %v1409_v27 = vpack.c.bf16 %v3709_v18, %v3713_v23 }
 0x18f   :  { %3726 = vtanh.f32 %v1113_v24  ;;  %3388 = vmatprep.mubr.msk.bf16.mxu1 %vm1446_vm1, %v1408_v25  ;;  %v1134_v35 = vadd.f32 %v4528_v29, %v3270_v26 }
 0x190   :  { %3728 = vtanh.f32 %v1118_v21  ;;  %v1125_v28 = vpop.f32.mrf.mxu0  ;;  %3389 = vmatmul.mubr.msk.bf16.gmra.mxu1 %vm1446_vm1, %v1409_v27  ;;  %v3715_v31 = vpop.eup %3714 }
 0x191   :  { %v1126_v30 = vadd.f32 %v4528_v29, %v1125_v28 }
 0x192   :  { %v3271_v55 = vpop.f32.mrf.mxu0  ;;  %v3717_v32 = vpop.eup %3716 }
 0x193   :  { %v1137_v33 = vadd.f32 %v4528_v29, %v3271_v55  ;;  %3730 = vtanh.f32 %v1126_v30 }
 0x194   :  { %v3719_v34 = vpop.eup %3718  ;;  %v1128_v36 = vpop.f32.mrf.mxu0 }
 0x195   :  { %v3721_v37 = vpop.eup %3720  ;;  %v1129_v38 = vadd.f32 %v4528_v29, %v1128_v36  ;;  %v1410_v39 = vpack.c.bf16 %v3719_v34, %v3715_v31  ;;  %3732 = vtanh.f32 %v1137_v33 }
 0x196   :  { %v3274_v40 = vpop.f32.mrf.mxu0  ;;  %v1411_v41 = vpack.c.bf16 %v3717_v32, %v3721_v37 }
 0x197   :  { %3734 = vtanh.f32 %v1129_v38  ;;  %3392 = vmatprep.mubr.msk.bf16.mxu1 %vm1446_vm1, %v1410_v39  ;;  %v1150_v49 = vadd.f32 %v4528_v29, %v3274_v40 }
 0x198   :  { %3736 = vtanh.f32 %v1134_v35  ;;  %v1141_v42 = vpop.f32.mrf.mxu0  ;;  %3393 = vmatmul.mubr.msk.bf16.gmra.mxu1 %vm1446_vm1, %v1411_v41  ;;  %v3723_v44 = vpop.eup %3722 }
 0x199   :  { %v1142_v43 = vadd.f32 %v4528_v29, %v1141_v42 }
 0x19a   :  { %v3275_v45 = vpop.f32.mrf.mxu0  ;;  %v3725_v46 = vpop.eup %3724 }
 0x19b   :  { %v1153_v47 = vadd.f32 %v4528_v29, %v3275_v45  ;;  %3738 = vtanh.f32 %v1142_v43 }
 0x19c   :  { %v3727_v48 = vpop.eup %3726  ;;  %v1144_v50 = vpop.f32.mrf.mxu0 }
 0x19d   :  { %v3729_v51 = vpop.eup %3728  ;;  %v1145_v52 = vadd.f32 %v4528_v29, %v1144_v50  ;;  %v1412_v53 = vpack.c.bf16 %v3727_v48, %v3723_v44  ;;  %3740 = vtanh.f32 %v1153_v47 }
 0x19e   :  { %v3278_v56 = vpop.f32.mrf.mxu0  ;;  %v1413_v57 = vpack.c.bf16 %v3725_v46, %v3729_v51 }
 0x19f   :  { %3742 = vtanh.f32 %v1145_v52  ;;  %v1166_v58 = vadd.f32 %v4528_v29, %v3278_v56  ;;  %3396 = vmatprep.mubr.msk.bf16.mxu1 %vm1446_vm1, %v1412_v53 }
 0x1a0   :  { %3744 = vtanh.f32 %v1150_v49  ;;  %v3302_v59 = vpop.f32.mrf.mxu1  ;;  %v1157_v60 = vpop.f32.mrf.mxu0  ;;  %3397 = vmatmul.mubr.msk.bf16.gmra.mxu1 %vm1446_vm1, %v1413_v57 }
 0x1a1   :  { %v1682_v61 = vadd.f32 %v3302_v59, %v4543_v54  ;;  %v1158_v62 = vadd.f32 %v4528_v29, %v1157_v60  ;;  %v3731_v63 = vpop.eup %3730  ;;  %3746 = vtanh.f32 %v1166_v58 }
 0x1a2   :  { %v1673_v0 = vpop.f32.mrf.mxu1  ;;  %v3279_v1 = vpop.f32.mrf.mxu0 }
 0x1a3   :  { %v3733_v2 = vpop.eup %3732  ;;  %v1169_v3 = vadd.f32 %v4528_v29, %v3279_v1  ;;  %3748 = vtanh.f32 %v1682_v61  ;;  %v1674_v11 = vadd.f32 %v4543_v54, %v1673_v0 }
 0x1a4   :  { %v3735_v4 = vpop.eup %3734  ;;  %v3303_v5 = vpop.f32.mrf.mxu1  ;;  %3750 = vtanh.f32 %v1158_v62 }
 0x1a5   :  { %v1160_v6 = vpop.f32.mrf.mxu0  ;;  %v3737_v7 = vpop.eup %3736  ;;  %v1685_v8 = vadd.f32 %v3303_v5, %v4543_v54  ;;  %v1414_v10 = vpack.c.bf16 %v3735_v4, %v3731_v63  ;;  %3752 = vtanh.f32 %v1169_v3 }
 0x1a6   :  { %v1161_v9 = vadd.f32 %v4528_v29, %v1160_v6  ;;  %v1676_v12 = vpop.f32.mrf.mxu1  ;;  %v1415_v14 = vpack.c.bf16 %v3733_v2, %v3737_v7 }
 0x1a7   :  { %v3282_v13 = vpop.f32.mrf.mxu0  ;;  %3754 = vtanh.f32 %v1685_v8  ;;  %v1677_v15 = vadd.f32 %v4543_v54, %v1676_v12  ;;  %3400 = vmatprep.mubr.msk.bf16.mxu1 %vm1446_vm1, %v1414_v10 }
 0x1a8   :  { %v1182_v16 = vadd.f32 %v4528_v29, %v3282_v13  ;;  %v3306_v17 = vpop.f32.mrf.mxu1  ;;  %3756 = vtanh.f32 %v1161_v9  ;;  %3401 = vmatmul.mubr.msk.bf16.gmra.mxu1 %vm1446_vm1, %v1415_v14  ;;  %v3739_v21 = vpop.eup %3738 }
 0x1a9   :  { %v1173_v18 = vpop.f32.mrf.mxu0  ;;  %3758 = vtanh.f32 %v1677_v15  ;;  %v1698_v19 = vadd.f32 %v3306_v17, %v4543_v54 }
 0x1aa   :  { %v1174_v20 = vadd.f32 %v4528_v29, %v1173_v18  ;;  %3760 = vtanh.f32 %v1674_v11  ;;  %v1689_v22 = vpop.f32.mrf.mxu1  ;;  %v3741_v24 = vpop.eup %3740 }
 0x1ab   :  { %v3283_v23 = vpop.f32.mrf.mxu0  ;;  %3762 = vtanh.f32 %v1182_v16  ;;  %v1690_v33 = vadd.f32 %v4543_v54, %v1689_v22 }
 0x1ac   :  { %v1185_v25 = vadd.f32 %v4528_v29, %v3283_v23  ;;  %v3743_v26 = vpop.eup %3742  ;;  %3764 = vtanh.f32 %v1698_v19  ;;  %v3307_v27 = vpop.f32.mrf.mxu1 }
 0x1ad   :  { %v1176_v28 = vpop.f32.mrf.mxu0  ;;  %v3745_v30 = vpop.eup %3744  ;;  %v1701_v31 = vadd.f32 %v3307_v27, %v4543_v54  ;;  %3766 = vtanh.f32 %v1174_v20  ;;  %v1416_v32 = vpack.c.bf16 %v3743_v26, %v3739_v21 }
 0x1ae   :  { %v1177_v55 = vadd.f32 %v4528_v29, %v1176_v28  ;;  %v1692_v34 = vpop.f32.mrf.mxu1  ;;  %3768 = vtanh.f32 %v1185_v25  ;;  %v1417_v36 = vpack.c.bf16 %v3741_v24, %v3745_v30  ;;  %v3747_v38 = vpop.eup %3746 }
 0x1af   :  { %v3286_v35 = vpop.f32.mrf.mxu0  ;;  %3770 = vtanh.f32 %v1701_v31  ;;  %v1693_v37 = vadd.f32 %v4543_v54, %v1692_v34  ;;  %3404 = vmatprep.mubr.msk.bf16.mxu1 %vm1446_vm1, %v1416_v32 }
 0x1b0   :  { %v4566_v39 = vpop.f32.mrf.mxu1  ;;  %3772 = vtanh.f32 %v1177_v55  ;;  %3405 = vmatmul.mubr.msk.bf16.gmra.mxu1 %vm1446_vm1, %v1417_v36  ;;  %v4569_v41 = vpop.eup %3748  ;;  %v1198_v52 = vadd.f32 %v4528_v29, %v3286_v35 }
 0x1b1   :  { %v1189_v40 = vpop.f32.mrf.mxu0  ;;  %3774 = vtanh.f32 %v1693_v37  ;;  %v3751_v42 = vpop.eup %3750 }
 0x1b2   :  { %3776 = vtanh.f32 %v1690_v33  ;;  %v4571_v43 = vpop.f32.mrf.mxu1  ;;  %v1190_v44 = vadd.f32 %v4528_v29, %v1189_v40  ;;  %v3753_v46 = vpop.eup %3752 }
 0x1b3   :  { %v3287_v45 = vpop.f32.mrf.mxu0  ;;  %v1419_v62 = vpack.c.bf16 %v3753_v46, %v3747_v38 }
 0x1b4   :  { %v1201_v47 = vadd.f32 %v4528_v29, %v3287_v45  ;;  %v4575_v48 = vpop.eup %3754  ;;  %v4577_v49 = vpop.f32.mrf.mxu1  ;;  %3778 = vtanh.f32 %v1190_v44 }
 0x1b5   :  { %v1192_v50 = vpop.f32.mrf.mxu0  ;;  %v3757_v51 = vpop.eup %3756  ;;  %v2313_v56 = vpack.c.bf16 %v4575_v48, %v4569_v41 }
 0x1b6   :  { %v1193_v53 = vadd.f32 %v4528_v29, %v1192_v50  ;;  %v4583_v57 = vpop.eup %3758  ;;  %v4585_v58 = vpop.f32.mrf.mxu1  ;;  %v1418_v60 = vpack.c.bf16 %v3757_v51, %v3751_v42  ;;  %3780 = vtanh.f32 %v1201_v47 }
 0x1b7   :  { %v3290_v59 = vpop.f32.mrf.mxu0  ;;  %v4587_v61 = vpop.eup %3760 }
 0x1b8   :  { %v3763_v63 = vpop.eup %3762  ;;  %v4589_v0 = vpop.f32.mrf.mxu1  ;;  %3782 = vtanh.f32 %v1193_v53  ;;  %3408 = vmatprep.mubr.msk.bf16.mxu1 %vm1446_vm1, %v1418_v60  ;;  %v2312_v2 = vpack.c.bf16 %v4583_v57, %v4587_v61  ;;  %v1214_v14 = vadd.f32 %v4528_v29, %v3290_v59 }
 0x1b9   :  { %v1205_v1 = vpop.f32.mrf.mxu0  ;;  %v4594_v3 = vpop.eup %3764  ;;  %3784 = vtanh.f32 %v1198_v52  ;;  %3409 = vmatmul.mubr.msk.bf16.gmra.mxu1 %vm1446_vm1, %v1419_v62 }
 0x1ba   :  { %v3767_v4 = vpop.eup %3766  ;;  %v4597_v5 = vpop.f32.mrf.mxu1  ;;  %v1206_v6 = vadd.f32 %v4528_v29, %v1205_v1 }
 0x1bb   :  { %v3291_v7 = vpop.f32.mrf.mxu0  ;;  %v3769_v8 = vpop.eup %3768 }
 0x1bc   :  { %v1217_v9 = vadd.f32 %v4528_v29, %v3291_v7  ;;  %v4601_v10 = vpop.eup %3770  ;;  %v4603_v11 = vpop.f32.mrf.mxu1  ;;  %3786 = vtanh.f32 %v1206_v6  ;;  %v1421_v22 = vpack.c.bf16 %v3769_v8, %v3763_v63 }
 0x1bd   :  { %v1208_v12 = vpop.f32.mrf.mxu0  ;;  %v3773_v13 = vpop.eup %3772  ;;  %v2315_v16 = vpack.c.bf16 %v4601_v10, %v4594_v3 }
 0x1be   :  { %v1209_v15 = vadd.f32 %v4528_v29, %v1208_v12  ;;  %v4609_v17 = vpop.eup %3774  ;;  %v4611_v18 = vpop.f32.mrf.mxu1  ;;  %v1420_v20 = vpack.c.bf16 %v3773_v13, %v3767_v4  ;;  %3788 = vtanh.f32 %v1217_v9 }
 0x1bf   :  { %v3294_v19 = vpop.f32.mrf.mxu0  ;;  %v4613_v21 = vpop.eup %3776 }
 0x1c0   :  { %v3318_v23 = vpop.f32.mrf.mxu1  ;;  %3790 = vtanh.f32 %v1209_v15  ;;  %3412 = vmatprep.mubr.msk.bf16.mxu1 %vm1446_vm1, %v1420_v20  ;;  %v2314_v25 = vpack.c.bf16 %v4609_v17, %v4613_v21  ;;  %v1230_v36 = vadd.f32 %v4528_v29, %v3294_v19  ;;  %v1733_v20 = vadd.f32 %v4603_v11, %v4543_v54 }
 0x1c1   :  { %v1221_v24 = vpop.f32.mrf.mxu0  ;;  %3792 = vtanh.f32 %v1214_v14  ;;  %v1746_v26 = vadd.f32 %v3318_v23, %v4543_v54  ;;  %3413 = vmatmul.mubr.msk.bf16.gmra.mxu1 %vm1446_vm1, %v1421_v22  ;;  %v3779_v31 = vpop.eup %3778  ;;  %v1722_v11 = vadd.f32 %v4543_v54, %v4597_v5 }
 0x1c2   :  { %v1222_v27 = vadd.f32 %v4528_v29, %v1221_v24  ;;  %v4621_v28 = vpop.f32.mrf.mxu1  ;;  %v1730_v24 = vadd.f32 %v4589_v0, %v4543_v54  ;;  %v1725_v0 = vadd.f32 %v4543_v54, %v4611_v18 }
 0x1c3   :  { %v3295_v30 = vpop.f32.mrf.mxu0  ;;  %v3781_v32 = vpop.eup %3780  ;;  %3794 = vtanh.f32 %v1746_v26 }
 0x1c4   :  { %v1233_v55 = vadd.f32 %v4528_v29, %v3295_v30  ;;  %v3319_v33 = vpop.f32.mrf.mxu1  ;;  %3796 = vtanh.f32 %v1222_v27 }
 0x1c5   :  { %v1224_v34 = vpop.f32.mrf.mxu0  ;;  %v3783_v35 = vpop.eup %3782  ;;  %v1749_v37 = vadd.f32 %v3319_v33, %v4543_v54 }
 0x1c6   :  { %v1225_v38 = vadd.f32 %v4528_v29, %v1224_v34  ;;  %v3785_v40 = vpop.eup %3784  ;;  %v4627_v42 = vpop.f32.mrf.mxu1  ;;  %3798 = vtanh.f32 %v1233_v55  ;;  %v1422_v44 = vpack.c.bf16 %v3783_v35, %v3779_v31 }
 0x1c7   :  { %3800 = vtanh.f32 %v1749_v37  ;;  %v1423_v45 = vpack.c.bf16 %v3781_v32, %v3785_v40 }
 0x1c8   :  { %v4629_v46 = vpop.f32.mrf.mxu1  ;;  %3802 = vtanh.f32 %v1225_v38  ;;  %3416 = vmatprep.mubr.msk.bf16.mxu1 %vm1446_vm1, %v1422_v44  ;;  %v1714_v44 = vadd.f32 %v4566_v39, %v4543_v54 }
 0x1c9   :  { %3804 = vtanh.f32 %v1230_v36  ;;  %3417 = vmatmul.mubr.msk.bf16.gmra.mxu1 %vm1446_vm1, %v1423_v45  ;;  %v3787_v50 = vpop.eup %3786 }
 0x1ca   :  { %v4633_v47 = vpop.f32.mrf.mxu1  ;;  %3806 = vtanh.f32 %v1733_v20 }
 0x1cb   :  { %v3789_v51 = vpop.eup %3788  ;;  %3808 = vtanh.f32 %v1730_v24 }
 0x1cc   :  { %v4635_v29 = vpop.f32.mrf.mxu1 }
 0x1cd   :  { %v3791_v52 = vpop.eup %3790 }
 0x1ce   :  { %v3793_v53 = vpop.eup %3792  ;;  %v4637_v59 = vpop.f32.mrf.mxu1  ;;  %v1424_v60 = vpack.c.bf16 %v3791_v52, %v3787_v50  ;;  %v1717_v50 = vadd.f32 %v4577_v49, %v4543_v54 }
 0x1cf   :  { %v1425_v62 = vpack.c.bf16 %v3789_v51, %v3793_v53 }
 0x1d0   :  { %v3326_v63 = vpop.f32.mrf.mxu1  ;;  %3420 = vmatprep.mubr.msk.bf16.mxu1 %vm1446_vm1, %v1424_v60  ;;  %v4640_v1 = vpop.eup %3794 }
 0x1d1   :  { %3421 = vmatmul.mubr.msk.bf16.gmra.mxu1 %vm1446_vm1, %v1425_v62  ;;  %v3797_v4 = vpop.eup %3796  ;;  %v1778_v34 = vadd.f32 %v3326_v63, %v4543_v54 }
 0x1d2   :  { %v1769_v6 = vpop.f32.mrf.mxu1 }
 0x1d3   :  { %v3799_v7 = vpop.eup %3798  ;;  %v1770_v53 = vadd.f32 %v4543_v54, %v1769_v6 }
 0x1d4   :  { %v4643_v8 = vpop.eup %3800  ;;  %v3327_v9 = vpop.f32.mrf.mxu1 }
 0x1d5   :  { %v3803_v12 = vpop.eup %3802  ;;  %v2321_v13 = vpack.c.bf16 %v4643_v8, %v4640_v1  ;;  %v1781_v36 = vadd.f32 %v3327_v9, %v4543_v54  ;;  %v2388_v1 = vsel %vm1446_vm1, %v2313_v56, 0 }
 0x1d6   :  { %v3805_v14 = vpop.eup %3804  ;;  %v1772_v15 = vpop.f32.mrf.mxu1  ;;  %v1426_v19 = vpack.c.bf16 %v3803_v12, %v3797_v4 }
 0x1d7   :  { %v1427_v22 = vpack.c.bf16 %v3799_v7, %v3805_v14  ;;  %v3807_v52 = vpop.eup %3806  ;;  %v1773_v62 = vadd.f32 %v4543_v54, %v1772_v15 }
 0x1d8   :  { %v3330_v23 = vpop.f32.mrf.mxu1  ;;  %3424 = vmatprep.mubr.msk.bf16.mxu1 %vm1446_vm1, %v1426_v19  ;;  %v3809_v63 = vpop.eup %3808 }
 0x1d9   :  { %3425 = vmatmul.mubr.msk.bf16.gmra.mxu1 %vm1446_vm1, %v1427_v22  ;;  %v1794_v26 = vadd.f32 %v3330_v23, %v4543_v54  ;;  %v2319_v9 = vpack.c.bf16 %v3807_v52, %v3809_v63  ;;  %v1709_v22 = vadd.f32 %v4543_v54, %v4585_v58 }
 0x1da   :  { %v1785_v27 = vpop.f32.mrf.mxu1 }
 0x1db   :  { %v1786_v30 = vadd.f32 %v4543_v54, %v1785_v27  ;;  %3810 = vtanh.f32 %v1794_v26  ;;  %v2406_v27 = vsel %vm1446_vm1, %v2319_v9, 0 }
 0x1dc   :  { %v3331_v31 = vpop.f32.mrf.mxu1 }
 0x1dd   :  { %v1797_v55 = vadd.f32 %v3331_v31, %v4543_v54  ;;  %v4684_v31 = vld [vmem:[%s5160_s5] sm:$0xf] }
 0x1de   :  { %v1788_v32 = vpop.f32.mrf.mxu1  ;;  %3110 = vmatprep.mubr.msk.bf16.mxu0 %vm1446_vm1, %v4684_v31  ;;  %3128 = vmatprep.mubr.msk.bf16.mxu1 %vm1446_vm1, %v4684_v31 }
 0x1df   :  { %3812 = vtanh.f32 %v1797_v55  ;;  %v1789_v33 = vadd.f32 %v4543_v54, %v1788_v32  ;;  %v1706_v32 = vadd.f32 %v4543_v54, %v4571_v43 }
 0x1e0   :  { %3814 = vtanh.f32 %v1786_v30  ;;  %v3334_v35 = vpop.f32.mrf.mxu1 }
 0x1e1   :  { %3816 = vtanh.f32 %v1789_v33  ;;  %v1810_v37 = vadd.f32 %v3334_v35, %v4543_v54  ;;  %v1765_v35 = vadd.f32 %v4635_v29, %v4543_v54 }
 0x1e2   :  { %3818 = vtanh.f32 %v1722_v11  ;;  %v1801_v38 = vpop.f32.mrf.mxu1 }
 0x1e3   :  { %3820 = vtanh.f32 %v1725_v0  ;;  %v1802_v5 = vadd.f32 %v4543_v54, %v1801_v38 }
 0x1e4   :  { %3822 = vtanh.f32 %v1778_v34  ;;  %v3335_v40 = vpop.f32.mrf.mxu1 }
 0x1e5   :  { %3824 = vtanh.f32 %v1781_v36  ;;  %v1813_v18 = vadd.f32 %v3335_v40, %v4543_v54 }
 0x1e6   :  { %3826 = vtanh.f32 %v1810_v37  ;;  %v1804_v45 = vpop.f32.mrf.mxu1 }
 0x1e7   :  { %3828 = vtanh.f32 %v1813_v18  ;;  %v1805_v51 = vadd.f32 %v4543_v54, %v1804_v45 }
 0x1e8   :  { %3830 = vtanh.f32 %v1802_v5  ;;  %v3338_v60 = vpop.f32.mrf.mxu1  ;;  %v3811_v7 = vpop.eup %3810  ;;  %v1762_v5 = vadd.f32 %v4629_v46, %v4543_v54 }
 0x1e9   :  { %3832 = vtanh.f32 %v1805_v51  ;;  %v1826_v39 = vadd.f32 %v3338_v60, %v4543_v54 }
 0x1ea   :  { %3834 = vtanh.f32 %v1714_v44  ;;  %v1817_v4 = vpop.f32.mrf.mxu1 }
 0x1eb   :  { %3836 = vtanh.f32 %v1717_v50  ;;  %v1818_v12 = vadd.f32 %v4543_v54, %v1817_v4 }
 0x1ec   :  { %v3813_v49 = vpop.eup %3812  ;;  %3838 = vtanh.f32 %v1770_v53  ;;  %v3339_v14 = vpop.f32.mrf.mxu1 }
 0x1ed   :  { %v3815_v19 = vpop.eup %3814  ;;  %3840 = vtanh.f32 %v1773_v62  ;;  %v1829_v6 = vadd.f32 %v3339_v14, %v4543_v54  ;;  %v2327_v20 = vpack.c.bf16 %v3813_v49, %v3811_v7 }
 0x1ee   :  { %v3817_v15 = vpop.eup %3816  ;;  %3842 = vtanh.f32 %v1826_v39  ;;  %v1820_v23 = vpop.f32.mrf.mxu1  ;;  %v1757_v39 = vadd.f32 %v4543_v54, %v4637_v59 }
 0x1ef   :  { %v3819_v24 = vpop.eup %3818  ;;  %3844 = vtanh.f32 %v1829_v6  ;;  %v1821_v26 = vadd.f32 %v4543_v54, %v1820_v23  ;;  %3428 = vmatprep.subr.msk.bf16.mxu0 %vm1446_vm1, %v2327_v20  ;;  %v2326_v30 = vpack.c.bf16 %v3817_v15, %v3815_v19 }
 0x1f0   :  { %v3821_v55 = vpop.eup %3820  ;;  %3846 = vtanh.f32 %v1818_v12  ;;  %v4686_v11 = vpop.f32.mrf.mxu1  ;;  %3095 = vmatpush3.bf16.xpose.msra.mxu0 %v2406_v27  ;;  %v1754_v12 = vadd.f32 %v4543_v54, %v4633_v47 }
 0x1f1   :  { %v3823_v58 = vpop.eup %3822  ;;  %3848 = vtanh.f32 %v1821_v26  ;;  %3429 = vmatprep.subr.msk.bf16.mxu0 %vm1446_vm1, %v2326_v30  ;;  %v2318_v36 = vpack.c.bf16 %v3821_v55, %v3819_v24 }
 0x1f2   :  { %v3825_v0 = vpop.eup %3824  ;;  %v4695_v33 = vpop.f32.mrf.mxu1  ;;  %3850 = vtanh.f32 %v1709_v22 }
 0x1f3   :  { %v4697_v34 = vpop.eup %3826  ;;  %3852 = vtanh.f32 %v1706_v32  ;;  %v2403_v29 = vsel %vm1446_vm1, %v2318_v36, 0  ;;  %v2325_v50 = vpack.c.bf16 %v3825_v0, %v3823_v58 }
 0x1f4   :  { %v4701_v37 = vpop.eup %3828  ;;  %v4703_v38 = vpop.f32.mrf.mxu1  ;;  %3854 = vtanh.f32 %v1765_v35 }
 0x1f5   :  { %v4705_v43 = vpop.eup %3830  ;;  %v2329_v40 = vpack.c.bf16 %v4701_v37, %v4697_v34  ;;  %3856 = vtanh.f32 %v1762_v5 }
 0x1f6   :  { %v4711_v18 = vpop.eup %3832  ;;  %v4713_v44 = vpop.f32.mrf.mxu1  ;;  %3858 = vtanh.f32 %v1757_v39  ;;  %v1738_v39 = vadd.f32 %v4543_v54, %v4621_v28 }
 0x1f7   :  { %v3835_v45 = vpop.eup %3834  ;;  %v2328_v51 = vpack.c.bf16 %v4711_v18, %v4705_v43  ;;  %3860 = vtanh.f32 %v1754_v12 }
 0x1f8   :  { %v3837_v52 = vpop.eup %3836  ;;  %v4718_v53 = vpop.f32.mrf.mxu1  ;;  %3097 = vmatpush3.bf16.xpose.msra.mxu0 %v2403_v29 }
 0x1f9   :  { %v3839_v46 = vpop.eup %3838  ;;  %3430 = vmatprep.subr.msk.bf16.mxu0 %vm1446_vm1, %v2325_v50  ;;  %v2317_v4 = vpack.c.bf16 %v3837_v52, %v3835_v45  ;;  %v1741_v52 = vadd.f32 %v4543_v54, %v4627_v42 }
 0x1fa   :  { %v3841_v60 = vpop.eup %3840  ;;  %v4721_v62 = vpop.f32.mrf.mxu1 }
 0x1fb   :  { %v4723_v63 = vpop.eup %3842  ;;  %v2400_v20 = vsel %vm1446_vm1, %v2317_v4, 0  ;;  %v2324_v59 = vpack.c.bf16 %v3841_v60, %v3839_v46 }
 0x1fc   :  { %v4727_v7 = vpop.eup %3844  ;;  %v3347_v9 = vpop.f32.mrf.mxu1 }
 0x1fd   :  { %v4729_v49 = vpop.eup %3846  ;;  %v2331_v14 = vpack.c.bf16 %v4727_v7, %v4723_v63  ;;  %v4915_v7 = vld [vmem:[%s5159_s4] ss:$0 sm:$0xff] }
 0x1fe   :  { %v4735_v19 = vpop.eup %3848  ;;  %v4737_v6 = vpop.f32.mrf.mxu1 }
 0x1ff   :  { %v2330_v15 = vpack.c.bf16 %v4735_v19, %v4729_v49  ;;  %v3851_v22 = vpop.eup %3850  ;;  %v1853_v8 = vadd.f32 %v4543_v54, %v4737_v6 }
 0x200   :  { %v3350_v23 = vpop.f32.mrf.mxu1  ;;  %3099 = vmatpush3.bf16.xpose.msra.mxu0 %v2400_v20  ;;  %v3853_v47 = vpop.eup %3852  ;;  %v2394_v20 = vsel %vm1446_vm1, %v2315_v16, 0  ;;  %v1861_v16 = vadd.f32 %v3347_v9, %v4543_v54 }
 0x201   :  { %3431 = vmatprep.subr.msk.bf16.mxu0 %vm1446_vm1, %v2324_v59  ;;  %v1874_v24 = vadd.f32 %v3350_v23, %v4543_v54  ;;  %v2316_v27 = vpack.c.bf16 %v3851_v22, %v3853_v47  ;;  %v3855_v30 = vpop.eup %3854 }
 0x202   :  { %v1865_v26 = vpop.f32.mrf.mxu1  ;;  %v3857_v0 = vpop.eup %3856 }
 0x203   :  { %v1866_v55 = vadd.f32 %v4543_v54, %v1865_v26  ;;  %3862 = vtanh.f32 %v1874_v24  ;;  %v2397_v5 = vsel %vm1446_vm1, %v2316_v27, 0  ;;  %v2323_v45 = vpack.c.bf16 %v3855_v30, %v3857_v0  ;;  %v3859_v46 = vpop.eup %3858 }
 0x204   :  { %v3351_v58 = vpop.f32.mrf.mxu1  ;;  %v3861_v4 = vpop.eup %3860  ;;  %v2391_v27 = vsel %vm1446_vm1, %v2314_v25, 0 }
 0x205   :  { %v1877_v32 = vadd.f32 %v3351_v58, %v4543_v54  ;;  %v2322_v59 = vpack.c.bf16 %v3859_v46, %v3861_v4  ;;  %v1858_v58 = vadd.f32 %v4718_v53, %v4543_v54  ;;  %v1850_v53 = vadd.f32 %v4543_v54, %v4721_v62 }
 0x206   :  { %v1868_v35 = vpop.f32.mrf.mxu1 }
 0x207   :  { %3864 = vtanh.f32 %v1877_v32  ;;  %v1869_v36 = vadd.f32 %v4543_v54, %v1868_v35 }
 0x208   :  { %3866 = vtanh.f32 %v1866_v55  ;;  %v4748_v29 = vpop.f32.mrf.mxu1  ;;  %3101 = vmatpush3.bf16.xpose.msra.mxu0 %v2397_v5 }
 0x209   :  { %3868 = vtanh.f32 %v1869_v36  ;;  %3432 = vmatprep.subr.msk.bf16.mxu0 %vm1446_vm1, %v2323_v45 }
 0x20a   :  { %v4751_v50 = vpop.f32.mrf.mxu1  ;;  %3870 = vtanh.f32 %v1741_v52 }
 0x20b   :  { %3872 = vtanh.f32 %v1738_v39  ;;  %v1842_v39 = vadd.f32 %v4686_v11, %v4543_v54 }
 0x20c   :  { %v4755_v60 = vpop.f32.mrf.mxu1  ;;  %3874 = vtanh.f32 %v1861_v16 }
 0x20d   :  { %3876 = vtanh.f32 %v1858_v58 }
 0x20e   :  { %v4759_v12 = vpop.f32.mrf.mxu1 }
 0x210   :  { %v3358_v22 = vpop.f32.mrf.mxu1  ;;  %3103 = vmatpush3.bf16.xpose.msra.mxu0 %v2394_v20  ;;  %v4766_v23 = vpop.eup %3862  ;;  %v1845_v20 = vadd.f32 %v4703_v38, %v4543_v54 }
 0x211   :  { %3433 = vmatprep.subr.msk.bf16.mxu0 %vm1446_vm1, %v2322_v59  ;;  %v1906_v45 = vadd.f32 %v3358_v22, %v4543_v54  ;;  %v2385_v59 = vsel %vm1446_vm1, %v2312_v2, 0 }
 0x212   :  { %v1897_v42 = vpop.f32.mrf.mxu1 }
 0x213   :  { %v1898_v16 = vadd.f32 %v4543_v54, %v1897_v42 }
 0x214   :  { %v4768_v47 = vpop.eup %3864  ;;  %v3359_v28 = vpop.f32.mrf.mxu1 }
 0x215   :  { %v4770_v24 = vpop.eup %3866  ;;  %v2337_v26 = vpack.c.bf16 %v4768_v47, %v4766_v23  ;;  %v1909_v62 = vadd.f32 %v3359_v28, %v4543_v54  ;;  %v2436_v47 = vsel %vm1446_vm1, %v2329_v40, 0 }
 0x216   :  { %v4774_v3 = vpop.eup %3868  ;;  %v1900_v10 = vpop.f32.mrf.mxu1 }
 0x217   :  { %v2336_v30 = vpack.c.bf16 %v4774_v3, %v4770_v24  ;;  %v3871_v17 = vpop.eup %3870  ;;  %v1901_v11 = vadd.f32 %v4543_v54, %v1900_v10 }
 0x218   :  { %v3362_v55 = vpop.f32.mrf.mxu1  ;;  %3105 = vmatpush3.bf16.xpose.msra.mxu0 %v2391_v27  ;;  %v3873_v35 = vpop.eup %3872 }
 0x219   :  { %3434 = vmatprep.subr.msk.bf16.mxu0 %vm1446_vm1, %v2321_v13  ;;  %v1922_v9 = vadd.f32 %v3362_v55, %v4543_v54  ;;  %v2320_v5 = vpack.c.bf16 %v3871_v17, %v3873_v35  ;;  %v3875_v28 = vpop.eup %3874 }
 0x21a   :  { %v1913_v32 = vpop.f32.mrf.mxu1  ;;  %v3877_v55 = vpop.eup %3876 }
 0x21b   :  { %v1914_v21 = vadd.f32 %v4543_v54, %v1913_v32  ;;  %3878 = vtanh.f32 %v1922_v9  ;;  %v2335_v61 = vpack.c.bf16 %v3875_v28, %v3877_v55 }
 0x21c   :  { %v3363_v25 = vpop.f32.mrf.mxu1 }
 0x21d   :  { %v1925_v0 = vadd.f32 %v3363_v25, %v4543_v54  ;;  %v1837_v25 = vadd.f32 %v4543_v54, %v4713_v44 }
 0x21e   :  { %v1916_v36 = vpop.f32.mrf.mxu1 }
 0x21f   :  { %3880 = vtanh.f32 %v1925_v0  ;;  %v1917_v13 = vadd.f32 %v4543_v54, %v1916_v36 }
 0x220   :  { %3882 = vtanh.f32 %v1914_v21  ;;  %3107 = vmatpush3.bf16.xpose.msra.mxu0 %v2388_v1  ;;  %v3366_v52 = vpop.f32.mrf.mxu1 }
 0x221   :  { %3884 = vtanh.f32 %v1917_v13  ;;  %3435 = vmatprep.subr.msk.bf16.mxu0 %vm1446_vm1, %v2320_v5  ;;  %v1938_v41 = vadd.f32 %v3366_v52, %v4543_v54  ;;  %v1834_v5 = vadd.f32 %v4543_v54, %v4695_v33  ;;  %v1890_v33 = vadd.f32 %v4748_v29, %v4543_v54 }
 0x222   :  { %3886 = vtanh.f32 %v1850_v53  ;;  %v1929_v48 = vpop.f32.mrf.mxu1  ;;  %v2454_v53 = vsel %vm1446_vm1, %v2335_v61, 0 }
 0x223   :  { %3888 = vtanh.f32 %v1853_v8  ;;  %v1930_v56 = vadd.f32 %v4543_v54, %v1929_v48 }
 0x224   :  { %3890 = vtanh.f32 %v1906_v45  ;;  %v3367_v6 = vpop.f32.mrf.mxu1 }
 0x225   :  { %3892 = vtanh.f32 %v1909_v62  ;;  %v1941_v46 = vadd.f32 %v3367_v6, %v4543_v54 }
 0x226   :  { %3894 = vtanh.f32 %v1938_v41  ;;  %v1932_v4 = vpop.f32.mrf.mxu1  ;;  %v1893_v41 = vadd.f32 %v4755_v60, %v4543_v54 }
 0x227   :  { %3896 = vtanh.f32 %v1941_v46  ;;  %v1933_v22 = vadd.f32 %v4543_v54, %v1932_v4 }
 0x228   :  { %3898 = vtanh.f32 %v1930_v56  ;;  %3109 = vmatpush3.bf16.xpose.msra.mxu0 %v2385_v59  ;;  %v3370_v27 = vpop.f32.mrf.mxu1  ;;  %v3879_v57 = vpop.eup %3878 }
 0x229   :  { %3900 = vtanh.f32 %v1933_v22  ;;  %v1954_v38 = vadd.f32 %v3370_v27, %v4543_v54 }
 0x22a   :  { %3902 = vtanh.f32 %v1842_v39  ;;  %v1945_v58 = vpop.f32.mrf.mxu1 }
 0x22b   :  { %3904 = vtanh.f32 %v1845_v20  ;;  %v1946_v9 = vadd.f32 %v4543_v54, %v1945_v58  ;;  %v1885_v58 = vadd.f32 %v4543_v54, %v4759_v12 }
 0x22c   :  { %v3881_v2 = vpop.eup %3880  ;;  %3906 = vtanh.f32 %v1898_v16  ;;  %v3371_v32 = vpop.f32.mrf.mxu1 }
 0x22d   :  { %v3883_v42 = vpop.eup %3882  ;;  %3908 = vtanh.f32 %v1901_v11  ;;  %v2343_v17 = vpack.c.bf16 %v3881_v2, %v3879_v57  ;;  %v1957_v21 = vadd.f32 %v3371_v32, %v4543_v54  ;;  %v1882_v32 = vadd.f32 %v4543_v54, %v4751_v50 }
 0x22e   :  { %v3885_v10 = vpop.eup %3884  ;;  %3910 = vtanh.f32 %v1954_v38  ;;  %v1948_v0 = vpop.f32.mrf.mxu1 }
 0x22f   :  { %v3887_v35 = vpop.eup %3886  ;;  %3436 = vmatprep.subr.msk.bf16.mxu1 %vm1446_vm1, %v2343_v17  ;;  %3912 = vtanh.f32 %v1957_v21  ;;  %v2342_v36 = vpack.c.bf16 %v3885_v10, %v3883_v42  ;;  %v1949_v1 = vadd.f32 %v4543_v54, %v1948_v0  ;;  %3111 = vmatmul.mubr.msk.bf16.vlgmr.msra.gmra.mxu0 %vm1446_vm1, %v4684_v31 }
 0x230   :  { %v3889_v8 = vpop.eup %3888  ;;  %3914 = vtanh.f32 %v1946_v9  ;;  %3113 = vmatpush3.bf16.xpose.msra.mxu1 %v2454_v53  ;;  %v4828_v13 = vpop.f32.mrf.mxu1  ;;  %3146 = vmatprep.mubr.msk.bf16.mxu0 %vm1446_vm1, %v4684_v31 }
 0x231   :  { %v3891_v44 = vpop.eup %3890  ;;  %3437 = vmatprep.subr.msk.bf16.mxu1 %vm1446_vm1, %v2342_v36  ;;  %3916 = vtanh.f32 %v1949_v1  ;;  %v2334_v48 = vpack.c.bf16 %v3889_v8, %v3887_v35 }
 0x232   :  { %v3893_v45 = vpop.eup %3892  ;;  %v4835_v52 = vpop.f32.mrf.mxu1  ;;  %3918 = vtanh.f32 %v1837_v25 }
 0x233   :  { %v4837_v62 = vpop.eup %3894  ;;  %3920 = vtanh.f32 %v1834_v5  ;;  %v2451_v60 = vsel %vm1446_vm1, %v2334_v48, 0  ;;  %v2341_v22 = vpack.c.bf16 %v3893_v45, %v3891_v44 }
 0x234   :  { %v4841_v56 = vpop.eup %3896  ;;  %v4843_v6 = vpop.f32.mrf.mxu1  ;;  %3922 = vtanh.f32 %v1893_v41 }
 0x235   :  { %v4845_v46 = vpop.eup %3898  ;;  %v2345_v39 = vpack.c.bf16 %v4841_v56, %v4837_v62  ;;  %3924 = vtanh.f32 %v1890_v33  ;;  %v1973_v3 = vadd.f32 %v4915_v7, %v4843_v6 }
 0x236   :  { %v4851_v4 = vpop.eup %3900  ;;  %v4853_v20 = vpop.f32.mrf.mxu1  ;;  %3926 = vtanh.f32 %v1885_v58 }
 0x237   :  { %v3903_v59 = vpop.eup %3902  ;;  %v2344_v28 = vpack.c.bf16 %v4851_v4, %v4845_v46  ;;  %3928 = vtanh.f32 %v1882_v32 }
 0x238   :  { %v3905_v16 = vpop.eup %3904  ;;  %3115 = vmatpush3.bf16.xpose.msra.mxu1 %v2451_v60  ;;  %v4858_v27 = vpop.f32.mrf.mxu1 }
 0x239   :  { %v3907_v29 = vpop.eup %3906  ;;  %3438 = vmatprep.subr.msk.bf16.mxu1 %vm1446_vm1, %v2341_v22  ;;  %v2333_v57 = vpack.c.bf16 %v3905_v16, %v3903_v59 }
 0x23a   :  { %v3909_v11 = vpop.eup %3908  ;;  %v4861_v55 = vpop.f32.mrf.mxu1 }
 0x23b   :  { %v4863_v38 = vpop.eup %3910  ;;  %v2448_v10 = vsel %vm1446_vm1, %v2333_v57, 0  ;;  %v2340_v12 = vpack.c.bf16 %v3909_v11, %v3907_v29 }
 0x23c   :  { %v4867_v61 = vpop.eup %3912  ;;  %v3379_v2 = vpop.f32.mrf.mxu1 }
 0x23d   :  { %v4869_v9 = vpop.eup %3914  ;;  %v2347_v42 = vpack.c.bf16 %v4867_v61, %v4863_v38 }
 0x23e   :  { %v4875_v17 = vpop.eup %3916  ;;  %v4877_v21 = vpop.f32.mrf.mxu1 }
 0x23f   :  { %v2346_v25 = vpack.c.bf16 %v4875_v17, %v4869_v9  ;;  %v3919_v0 = vpop.eup %3918  ;;  %v1981_v23 = vadd.f32 %v4915_v7, %v4877_v21 }
 0x240   :  { %3117 = vmatpush3.bf16.xpose.msra.mxu1 %v2448_v10  ;;  %v3382_v35 = vpop.f32.mrf.mxu1  ;;  %v3921_v50 = vpop.eup %3920 }
 0x241   :  { %3439 = vmatprep.subr.msk.bf16.mxu1 %vm1446_vm1, %v2340_v12  ;;  %v2002_v53 = vadd.f32 %v3382_v35, %v4543_v54  ;;  %v2332_v1 = vpack.c.bf16 %v3919_v0, %v3921_v50  ;;  %v3923_v8 = vpop.eup %3922  ;;  %v2487_v61 = vsel %vm1446_vm1, %v2346_v25, 0 }
 0x242   :  { %v1993_v36 = vpop.f32.mrf.mxu1  ;;  %v3925_v41 = vpop.eup %3924 }
 0x243   :  { %v1994_v44 = vadd.f32 %v4543_v54, %v1993_v36  ;;  %3930 = vtanh.f32 %v2002_v53  ;;  %v2445_v33 = vsel %vm1446_vm1, %v2332_v1, 0  ;;  %v2339_v59 = vpack.c.bf16 %v3923_v8, %v3925_v41  ;;  %v3927_v29 = vpop.eup %3926 }
 0x244   :  { %v3383_v5 = vpop.f32.mrf.mxu1  ;;  %v3929_v58 = vpop.eup %3928  ;;  %v2439_v8 = vsel %vm1446_vm1, %v2330_v15, 0 }
 0x245   :  { %v2005_v45 = vadd.f32 %v3383_v5, %v4543_v54  ;;  %v2338_v32 = vpack.c.bf16 %v3927_v29, %v3929_v58  ;;  %v1970_v29 = vadd.f32 %v4915_v7, %v4828_v13 }
 0x246   :  { %v1996_v48 = vpop.f32.mrf.mxu1 }
 0x247   :  { %3932 = vtanh.f32 %v2005_v45  ;;  %v1997_v60 = vadd.f32 %v4543_v54, %v1996_v48  ;;  %v2442_v54 = vsel %vm1446_vm1, %v2331_v14, 0  ;;  %v1989_v14 = vadd.f32 %v4915_v7, %v3379_v2 }
 0x248   :  { %3934 = vtanh.f32 %v1994_v44  ;;  %3119 = vmatpush3.bf16.xpose.msra.mxu1 %v2445_v33  ;;  %v4888_v22 = vpop.f32.mrf.mxu1  ;;  %v1986_v45 = vadd.f32 %v4915_v7, %v4858_v27  ;;  %v1978_v48 = vadd.f32 %v4915_v7, %v4861_v55 }
 0x249   :  { %3440 = vmatprep.subr.msk.bf16.mxu1 %vm1446_vm1, %v2339_v59  ;;  %3936 = vtanh.f32 %v1997_v60 }
 0x24a   :  { %v4891_v16 = vpop.f32.mrf.mxu1  ;;  %3938 = vtanh.f32 %v1989_v14 }
 0x24b   :  { %3940 = vtanh.f32 %v1986_v45 }
 0x24c   :  { %v4893_v11 = vpop.f32.mrf.mxu1 }
 0x24e   :  { %v4895_v57 = vpop.f32.mrf.mxu1 }
 0x250   :  { %3121 = vmatpush3.bf16.xpose.msra.mxu1 %v2442_v54  ;;  %v3390_v10 = vpop.f32.mrf.mxu1  ;;  %v4902_v0 = vpop.eup %3930 }
 0x251   :  { %3441 = vmatprep.subr.msk.bf16.mxu1 %vm1446_vm1, %v2338_v32  ;;  %v2034_v33 = vadd.f32 %v4915_v7, %v3390_v10 }
 0x252   :  { %v2025_v12 = vpop.f32.mrf.mxu1 }
 0x253   :  { %v2026_v32 = vadd.f32 %v4915_v7, %v2025_v12 }
 0x254   :  { %v4904_v35 = vpop.eup %3932  ;;  %v3391_v50 = vpop.f32.mrf.mxu1 }
 0x255   :  { %v4906_v53 = vpop.eup %3934  ;;  %v2353_v36 = vpack.c.bf16 %v4904_v35, %v4902_v0  ;;  %v2037_v55 = vadd.f32 %v4915_v7, %v3391_v50  ;;  %v2484_v0 = vsel %vm1446_vm1, %v2345_v39, 0  ;;  %v2481_v39 = vsel %vm1446_vm1, %v2344_v28, 0 }
 0x256   :  { %v4910_v1 = vpop.eup %3936  ;;  %v2028_v63 = vpop.f32.mrf.mxu1 }
 0x257   :  { %v2352_v44 = vpack.c.bf16 %v4910_v1, %v4906_v53  ;;  %v3939_v54 = vpop.eup %3938  ;;  %v2029_v13 = vadd.f32 %v4915_v7, %v2028_v63 }
 0x258   :  { %3123 = vmatpush3.bf16.xpose.msra.mxu1 %v2439_v8  ;;  %v3394_v5 = vpop.f32.mrf.mxu1  ;;  %v3941_v50 = vpop.eup %3940 }
 0x259   :  { %3442 = vmatprep.subr.msk.bf16.mxu1 %vm1446_vm1, %v2337_v26  ;;  %v2050_v2 = vadd.f32 %v4915_v7, %v3394_v5  ;;  %v2351_v18 = vpack.c.bf16 %v3939_v54, %v3941_v50 }
 0x25a   :  { %v2041_v41 = vpop.f32.mrf.mxu1 }
 0x25b   :  { %v2042_v49 = vadd.f32 %v4915_v7, %v2041_v41  ;;  %3942 = vtanh.f32 %v2050_v2  ;;  %v1965_v41 = vadd.f32 %v4915_v7, %v4853_v20  ;;  %v165_v20 = vld [vmem:[%s5161_s6] sm:$0xff] }
 0x25c   :  { %v3395_v19 = vpop.f32.mrf.mxu1 }
 0x25d   :  { %v2053_v15 = vadd.f32 %v4915_v7, %v3395_v19 }
 0x25e   :  { %v2044_v27 = vpop.f32.mrf.mxu1 }
 0x25f   :  { %3944 = vtanh.f32 %v2053_v15  ;;  %v2045_v26 = vadd.f32 %v4915_v7, %v2044_v27 }
 0x260   :  { %3946 = vtanh.f32 %v2042_v49  ;;  %3125 = vmatpush3.bf16.xpose.msra.mxu1 %v2436_v47  ;;  %v3398_v59 = vpop.f32.mrf.mxu1 }
 0x261   :  { %3443 = vmatprep.subr.msk.bf16.mxu1 %vm1446_vm1, %v2336_v30  ;;  %3948 = vtanh.f32 %v2045_v26  ;;  %v2066_v34 = vadd.f32 %v4915_v7, %v3398_v59  ;;  %v2433_v30 = vsel %vm1446_vm1, %v2328_v51, 0  ;;  %v4067_v59 = vmov 0  }
 0x262   :  { %3950 = vtanh.f32 %v1978_v48  ;;  %v2057_v37 = vpop.f32.mrf.mxu1  ;;  %v2502_v48 = vsel %vm1446_vm1, %v2351_v18, 0  ;;  %3462 = vset.pattern.permute.xlu0 %v4067_v59 }
 0x263   :  { %3952 = vtanh.f32 %v1981_v23  ;;  %v2058_v40 = vadd.f32 %v4915_v7, %v2057_v37  ;;  %2378 = vperm.xlu0 %3462, %v165_v20  }
 0x264   :  { %3954 = vtanh.f32 %v2034_v33  ;;  %v3399_v21 = vpop.f32.mrf.mxu1  ;;  %v1962_v33 = vadd.f32 %v4915_v7, %v4835_v52 }
 0x265   :  { %3956 = vtanh.f32 %v2037_v55  ;;  %v2069_v60 = vadd.f32 %v4915_v7, %v3399_v21 }
 0x266   :  { %3958 = vtanh.f32 %v2066_v34  ;;  %v2060_v24 = vpop.f32.mrf.mxu1 }
 0x267   :  { %3960 = vtanh.f32 %v2069_v60  ;;  %v2061_v58 = vadd.f32 %v4915_v7, %v2060_v24  ;;  %v2018_v24 = vadd.f32 %v4915_v7, %v4888_v22 }
 0x268   :  { %3962 = vtanh.f32 %v2058_v40  ;;  %3127 = vmatpush3.bf16.xpose.msra.mxu1 %v2433_v30  ;;  %v3402_v10 = vpop.f32.mrf.mxu1  ;;  %v3943_v43 = vpop.eup %3942  ;;  %v2021_v40 = vadd.f32 %v4915_v7, %v4893_v11 }
 0x269   :  { %3964 = vtanh.f32 %v2061_v58  ;;  %v2082_v6 = vadd.f32 %v4915_v7, %v3402_v10 }
 0x26a   :  { %3966 = vtanh.f32 %v1970_v29  ;;  %v2073_v14 = vpop.f32.mrf.mxu1 }
 0x26b   :  { %3968 = vtanh.f32 %v1973_v3  ;;  %v2074_v8 = vadd.f32 %v4915_v7, %v2073_v14 }
 0x26c   :  { %v3945_v51 = vpop.eup %3944  ;;  %3970 = vtanh.f32 %v2026_v32  ;;  %v3403_v5 = vpop.f32.mrf.mxu1 }
 0x26d   :  { %v3947_v12 = vpop.eup %3946  ;;  %3972 = vtanh.f32 %v2029_v13  ;;  %v2085_v45 = vadd.f32 %v4915_v7, %v3403_v5  ;;  %v2359_v2 = vpack.c.bf16 %v3945_v51, %v3943_v43  ;;  %v2013_v43 = vadd.f32 %v4915_v7, %v4895_v57 }
 0x26e   :  { %v3949_v63 = vpop.eup %3948  ;;  %3974 = vtanh.f32 %v2082_v6  ;;  %v2076_v49 = vpop.f32.mrf.mxu1 }
 0x26f   :  { %v3951_v19 = vpop.eup %3950  ;;  %3976 = vtanh.f32 %v2085_v45  ;;  %v2077_v15 = vadd.f32 %v4915_v7, %v2076_v49  ;;  %3444 = vmatprep.subr.msk.bf16.mxu0 %vm1446_vm1, %v2359_v2  ;;  %v2358_v27 = vpack.c.bf16 %v3949_v63, %v3947_v12  ;;  %3129 = vmatmul.mubr.msk.bf16.vlgmr.msra.gmra.mxu1 %vm1446_vm1, %v4684_v31  ;;  %v2010_v12 = vadd.f32 %v4915_v7, %v4891_v16 }
 0x270   :  { %v3953_v23 = vpop.eup %3952  ;;  %3978 = vtanh.f32 %v2074_v8  ;;  %v4972_v47 = vpop.f32.mrf.mxu1  ;;  %3131 = vmatpush3.bf16.xpose.msra.mxu0 %v2502_v48  ;;  %3164 = vmatprep.mubr.msk.bf16.mxu1 %vm1446_vm1, %v4684_v31 }
 0x271   :  { %v3955_v26 = vpop.eup %3954  ;;  %3980 = vtanh.f32 %v2077_v15  ;;  %3445 = vmatprep.subr.msk.bf16.mxu0 %vm1446_vm1, %v2358_v27  ;;  %v2350_v21 = vpack.c.bf16 %v3953_v23, %v3951_v19 }
 0x272   :  { %v3957_v55 = vpop.eup %3956  ;;  %v4982_v34 = vpop.f32.mrf.mxu1  ;;  %3982 = vtanh.f32 %v1965_v41 }
 0x273   :  { %v4984_v37 = vpop.eup %3958  ;;  %3984 = vtanh.f32 %v1962_v33  ;;  %v2499_v11 = vsel %vm1446_vm1, %v2350_v21, 0  ;;  %v2357_v32 = vpack.c.bf16 %v3957_v55, %v3955_v26 }
 0x274   :  { %v4988_v60 = vpop.eup %3960  ;;  %v4990_v29 = vpop.f32.mrf.mxu1  ;;  %3986 = vtanh.f32 %v2021_v40 }
 0x275   :  { %v4992_v52 = vpop.eup %3962  ;;  %v2361_v3 = vpack.c.bf16 %v4988_v60, %v4984_v37  ;;  %3988 = vtanh.f32 %v2018_v24  ;;  %v2101_v53 = vadd.f32 %v4915_v7, %v4990_v29  ;;  %v4044_v37 = vld [vmem:[%s5160_s5] sm:$0xf]  ;;  %s4068_s5 = smov [#allocation2]  }
 0x276   :  { %v4998_v30 = vpop.eup %3964  ;;  %v5000_v58 = vpop.f32.mrf.mxu1  ;;  %3990 = vtanh.f32 %v2013_v43  ;;  %s2754_s20 = sshll.u32 %s4068_s5, 4  ;;  %s2755_s20 = int_to_ptr.vmem [resolvable:$true] %s2754_s20 }
 0x277   :  { %v3967_v54 = vpop.eup %3966  ;;  %v2360_v10 = vpack.c.bf16 %v4998_v30, %v4992_v52  ;;  %3992 = vtanh.f32 %v2010_v12  ;;  %v2490_v12 = vsel %vm1446_vm1, %v2347_v42, 0  ;;  %s4045_s21 = scalar_lea.vmem %s2755_s20, 1024  ;;  %p4050_p1 = scmp.lt.s32.totalorder %s2755_s20, %s2755_s20 }
 0x278   :  { %v3969_v13 = vpop.eup %3968  ;;  %3133 = vmatpush3.bf16.xpose.msra.mxu0 %v2499_v11  ;;  %p4046_p0 = scmp.ne.s32.totalorder %s2755_s20, %s4045_s21  ;;  %p4051_p2 = scmp.lt.s32.totalorder %s4045_s21, %s4045_s21 }
 0x279   :  { %v3971_v50 = vpop.eup %3970  ;;  %v5005_v22 = vpop.f32.mrf.mxu1  ;;  %3446 = vmatprep.subr.msk.bf16.mxu0 %vm1446_vm1, %v2357_v32  ;;  %v2349_v51 = vpack.c.bf16 %v3969_v13, %v3967_v54 }
 0x27a   :  { %v3973_v6 = vpop.eup %3972  ;;  %p4052_p3 = por %p4051_p2, %p4050_p1 }
 0x27b   :  { %v5008_v14 = vpop.eup %3974  ;;  %v5012_v18 = vpop.f32.mrf.mxu1  ;;  %v2496_v57 = vsel %vm1446_vm1, %v2349_v51, 0  ;;  %v2356_v49 = vpack.c.bf16 %v3973_v6, %v3971_v50 }
 0x27c   :  { %v5014_v8 = vpop.eup %3976  ;;  %p4053_p4 = pnand %p4052_p3, %p4046_p0 }
 0x27d   :  { %v5016_v5 = vpop.eup %3978  ;;  %v3411_v45 = vpop.f32.mrf.mxu1  ;;  %v2363_v2 = vpack.c.bf16 %v5014_v8, %v5008_v14  ;;  %v2532_v14 = vsel %vm1446_vm1, %v2361_v3, 0  ;;  %v2529_v8 = vsel %vm1446_vm1, %v2360_v10, 0 }
 0x27e   :  { %v5022_v63 = vpop.eup %3980  ;;  %v2117_v42 = vadd.f32 %v4915_v7, %v3411_v45 }
 0x27f   :  { %v5024_v41 = vpop.f32.mrf.mxu1  ;;  %v2362_v19 = vpack.c.bf16 %v5022_v63, %v5016_v5  ;;  %v3983_v15 = vpop.eup %3982 }
 0x280   :  { %3135 = vmatpush3.bf16.xpose.msra.mxu0 %v2496_v57  ;;  %v3985_v16 = vpop.eup %3984 }
 0x281   :  { %v3414_v48 = vpop.f32.mrf.mxu1  ;;  %3447 = vmatprep.subr.msk.bf16.mxu0 %vm1446_vm1, %v2356_v49  ;;  %v2348_v20 = vpack.c.bf16 %v3983_v15, %v3985_v16  ;;  %v3987_v26 = vpop.eup %3986 }
 0x282   :  { %v2130_v27 = vadd.f32 %v4915_v7, %v3414_v48  ;;  %v3989_v55 = vpop.eup %3988 }
 0x283   :  { %v2121_v23 = vpop.f32.mrf.mxu1  ;;  %v2493_v24 = vsel %vm1446_vm1, %v2348_v20, 0  ;;  %v2355_v54 = vpack.c.bf16 %v3987_v26, %v3989_v55  ;;  %v3991_v50 = vpop.eup %3990  ;;  %v2114_v55 = vadd.f32 %v4915_v7, %v5005_v22 }
 0x284   :  { %v2122_v33 = vadd.f32 %v4915_v7, %v2121_v23  ;;  %3994 = vtanh.f32 %v2130_v27  ;;  %v3993_v43 = vpop.eup %3992 }
 0x285   :  { %v3415_v59 = vpop.f32.mrf.mxu1  ;;  %v2354_v57 = vpack.c.bf16 %v3991_v50, %v3993_v43 }
 0x286   :  { %v2133_v40 = vadd.f32 %v4915_v7, %v3415_v59 }
 0x287   :  { %v2124_v21 = vpop.f32.mrf.mxu1 }
 0x288   :  { %3996 = vtanh.f32 %v2133_v40  ;;  %v2125_v11 = vadd.f32 %v4915_v7, %v2124_v21  ;;  %3137 = vmatpush3.bf16.xpose.msra.mxu0 %v2493_v24  ;;  %v2106_v21 = vadd.f32 %v4915_v7, %v5012_v18 }
 0x289   :  { %3998 = vtanh.f32 %v2122_v33  ;;  %v5035_v32 = vpop.f32.mrf.mxu1  ;;  %3448 = vmatprep.subr.msk.bf16.mxu0 %vm1446_vm1, %v2355_v54 }
 0x28a   :  { %4000 = vtanh.f32 %v2125_v11 }
 0x28b   :  { %v5038_v13 = vpop.f32.mrf.mxu1  ;;  %4002 = vtanh.f32 %v2117_v42 }
 0x28c   :  { %4004 = vtanh.f32 %v2114_v55 }
 0x28d   :  { %v5040_v6 = vpop.f32.mrf.mxu1 }
 0x28f   :  { %v5042_v51 = vpop.f32.mrf.mxu1 }
 0x290   :  { %3139 = vmatpush3.bf16.xpose.msra.mxu0 %v2490_v12 }
 0x291   :  { %v3422_v49 = vpop.f32.mrf.mxu1  ;;  %3449 = vmatprep.subr.msk.bf16.mxu0 %vm1446_vm1, %v2354_v57  ;;  %v5049_v48 = vpop.eup %3994  ;;  %v2090_v57 = vadd.f32 %v4915_v7, %v4982_v34 }
 0x292   :  { %v2162_v56 = vadd.f32 %v4915_v7, %v3422_v49 }
 0x293   :  { %v2153_v15 = vpop.f32.mrf.mxu1 }
 0x294   :  { %v2154_v4 = vadd.f32 %v4915_v7, %v2153_v15 }
 0x295   :  { %v5051_v16 = vpop.eup %3996  ;;  %v3423_v27 = vpop.f32.mrf.mxu1 }
 0x296   :  { %v5053_v23 = vpop.eup %3998  ;;  %v2369_v20 = vpack.c.bf16 %v5051_v16, %v5049_v48  ;;  %v2165_v62 = vadd.f32 %v4915_v7, %v3423_v27  ;;  %v2146_v27 = vadd.f32 %v4915_v7, %v5035_v32 }
 0x297   :  { %v5057_v26 = vpop.eup %4000  ;;  %v2156_v38 = vpop.f32.mrf.mxu1 }
 0x298   :  { %3141 = vmatpush3.bf16.xpose.msra.mxu0 %v2487_v61  ;;  %v2368_v33 = vpack.c.bf16 %v5057_v26, %v5053_v23  ;;  %v4003_v1 = vpop.eup %4002  ;;  %v2157_v24 = vadd.f32 %v4915_v7, %v2156_v38 }
 0x299   :  { %v3426_v59 = vpop.f32.mrf.mxu1  ;;  %3450 = vmatprep.subr.msk.bf16.mxu0 %vm1446_vm1, %v2353_v36  ;;  %v2109_v36 = vadd.f32 %v4915_v7, %v5024_v41  ;;  %v4005_v18 = vpop.eup %4004 }
 0x29a   :  { %v2178_v40 = vadd.f32 %v4915_v7, %v3426_v59  ;;  %v2367_v54 = vpack.c.bf16 %v4003_v1, %v4005_v18 }
 0x29b   :  { %v2169_v9 = vpop.f32.mrf.mxu1 }
 0x29c   :  { %v2170_v17 = vadd.f32 %v4915_v7, %v2169_v9  ;;  %4006 = vtanh.f32 %v2178_v40  ;;  %v2550_v50 = vsel %vm1446_vm1, %v2367_v54, 0  ;;  %v2138_v9 = vadd.f32 %v4915_v7, %v5038_v13 }
 0x29d   :  { %v3427_v25 = vpop.f32.mrf.mxu1 }
 0x29e   :  { %v2181_v45 = vadd.f32 %v4915_v7, %v3427_v25 }
 0x29f   :  { %v2172_v35 = vpop.f32.mrf.mxu1 }
 0x2a0   :  { %4008 = vtanh.f32 %v2181_v45  ;;  %3143 = vmatpush3.bf16.xpose.msra.mxu0 %v2484_v0  ;;  %v2173_v22 = vadd.f32 %v4915_v7, %v2172_v35 }
 0x2a1   :  { %4010 = vtanh.f32 %v2170_v17  ;;  %3451 = vmatprep.subr.msk.bf16.mxu0 %vm1446_vm1, %v2352_v44  ;;  %v2098_v44 = vadd.f32 %v4915_v7, %v4972_v47  ;;  %v2093_v47 = vadd.f32 %v4915_v7, %v5000_v58 }
 0x2a2   :  { %4012 = vtanh.f32 %v2173_v22 }
 0x2a3   :  { %4014 = vtanh.f32 %v2109_v36 }
 0x2a4   :  { %4016 = vtanh.f32 %v2106_v21 }
 0x2a5   :  { %4018 = vtanh.f32 %v2165_v62  ;;  %v2538_v62 = vsel %vm1446_vm1, %v2363_v2, 0 }
 0x2a6   :  { %4020 = vtanh.f32 %v2162_v56 }
 0x2a7   :  { %4022 = vtanh.f32 %v2101_v53 }
 0x2a8   :  { %3145 = vmatpush3.bf16.xpose.msra.mxu0 %v2481_v39  ;;  %4024 = vtanh.f32 %v2098_v44  ;;  %v2535_v39 = vsel %vm1446_vm1, %v2362_v19, 0 }
 0x2a9   :  { %v4007_v41 = vpop.eup %4006  ;;  %4026 = vtanh.f32 %v2157_v24 }
 0x2aa   :  { %4028 = vtanh.f32 %v2154_v4 }
 0x2ab   :  { %4030 = vtanh.f32 %v2093_v47 }
 0x2ac   :  { %4032 = vtanh.f32 %v2090_v57 }
 0x2ad   :  { %v4009_v11 = vpop.eup %4008 }
 0x2ae   :  { %v4011_v46 = vpop.eup %4010  ;;  %v2375_v28 = vpack.c.bf16 %v4009_v11, %v4007_v41 }
 0x2af   :  { %v4013_v29 = vpop.eup %4012  ;;  %3147 = vmatmul.mubr.msk.bf16.vlgmr.msra.gmra.mxu0 %vm1446_vm1, %v4684_v31  ;;  %v2149_v31 = vadd.f32 %v4915_v7, %v5040_v6  ;;  %v2141_v6 = vadd.f32 %v4915_v7, %v5042_v51 }
 0x2b0   :  { %3452 = vmatprep.subr.msk.bf16.mxu1 %vm1446_vm1, %v2375_v28  ;;  %v2374_v43 = vpack.c.bf16 %v4013_v29, %v4011_v46  ;;  %v4015_v12 = vpop.eup %4014 }
 0x2b1   :  { %3149 = vmatpush3.bf16.xpose.msra.mxu1 %v2550_v50  ;;  %v4017_v49 = vpop.eup %4016  ;;  %4034 = vtanh.f32 %v2149_v31 }
 0x2b2   :  { %3453 = vmatprep.subr.msk.bf16.mxu1 %vm1446_vm1, %v2374_v43  ;;  %v2366_v58 = vpack.c.bf16 %v4015_v12, %v4017_v49  ;;  %v4019_v15 = vpop.eup %4018  ;;  %4036 = vtanh.f32 %v2146_v27 }
 0x2b3   :  { %v4021_v38 = vpop.eup %4020  ;;  %4038 = vtanh.f32 %v2141_v6 }
 0x2b4   :  { %v2547_v61 = vsel %vm1446_vm1, %v2366_v58, 0  ;;  %v2373_v42 = vpack.c.bf16 %v4019_v15, %v4021_v38  ;;  %v4023_v34 = vpop.eup %4022  ;;  %4040 = vtanh.f32 %v2138_v9 }
 0x2b5   :  { %v4025_v59 = vpop.eup %4024 }
 0x2b6   :  { %v2365_v55 = vpack.c.bf16 %v4023_v34, %v4025_v59  ;;  %v4027_v40 = vpop.eup %4026 }
 0x2b7   :  { %v4029_v32 = vpop.eup %4028 }
 0x2b8   :  { %v2544_v17 = vsel %vm1446_vm1, %v2365_v55, 0  ;;  %v2372_v25 = vpack.c.bf16 %v4027_v40, %v4029_v32  ;;  %v4031_v45 = vpop.eup %4030 }
 0x2b9   :  { %3151 = vmatpush3.bf16.xpose.msra.mxu1 %v2547_v61  ;;  %v4033_v0 = vpop.eup %4032 }
 0x2ba   :  { %3454 = vmatprep.subr.msk.bf16.mxu1 %vm1446_vm1, %v2373_v42  ;;  %v2364_v35 = vpack.c.bf16 %v4031_v45, %v4033_v0 }
 0x2bc   :  { %v2541_v51 = vsel %vm1446_vm1, %v2364_v35, 0 }
 0x2be   :  { %v4035_v36 = vpop.eup %4034 }
 0x2bf   :  { %v4037_v22 = vpop.eup %4036 }
 0x2c0   :  { %v2371_v21 = vpack.c.bf16 %v4035_v36, %v4037_v22  ;;  %v4039_v7 = vpop.eup %4038 }
 0x2c1   :  { %3153 = vmatpush3.bf16.xpose.msra.mxu1 %v2544_v17  ;;  %v4041_v13 = vpop.eup %4040 }
 0x2c2   :  { %3455 = vmatprep.subr.msk.bf16.mxu1 %vm1446_vm1, %v2372_v25  ;;  %v2370_v56 = vpack.c.bf16 %v4039_v7, %v4041_v13 }
 0x2c9   :  { %3155 = vmatpush3.bf16.xpose.msra.mxu1 %v2541_v51 }
 0x2ca   :  { %3456 = vmatprep.subr.msk.bf16.mxu1 %vm1446_vm1, %v2371_v21 }
 0x2d1   :  { %3157 = vmatpush3.bf16.xpose.msra.mxu1 %v2538_v62 }
 0x2d2   :  { %3457 = vmatprep.subr.msk.bf16.mxu1 %vm1446_vm1, %v2370_v56 }
 0x2d9   :  { %3159 = vmatpush3.bf16.xpose.msra.mxu1 %v2535_v39 }
 0x2da   :  { %3458 = vmatprep.subr.msk.bf16.mxu1 %vm1446_vm1, %v2369_v20 }
 0x2de   :  { %v2379_v5 = vpop.permute.xlu0 %2378 }
 0x2e1   :  { %3161 = vmatpush3.bf16.xpose.msra.mxu1 %v2532_v14 }
 0x2e2   :  { %3459 = vmatprep.subr.msk.bf16.mxu1 %vm1446_vm1, %v2368_v33 }
 0x2e9   :  { %3163 = vmatpush3.bf16.xpose.msra.mxu1 %v2529_v8 }
 0x2ef   :  { %v2610_v2 = vpop.f32.mrf.mxu0 }
 0x2f0   :  { %3165 = vmatmul.mubr.msk.bf16.vlgmr.msra.gmra.mxu1 %vm1446_vm1, %v4044_v37  ;;  %v2611_v60 = vadd.f32 %v2610_v2, %v2379_v5 }
 0x2f1   :  { %v2612_v3 = vpop.f32.mrf.mxu0 }
 0x2f2   :  { %v2613_v63 = vadd.f32 %v2612_v3, %v2379_v5  ;;  %2740 = vst [vmem:[#allocation2] sm:$0xff] %v2611_v60 }
 0x2f3   :  { %v2614_v19 = vpop.f32.mrf.mxu0 }
 0x2f4   :  { %2741 = vst [vmem:[#allocation2 + $0x8] sm:$0xff] %v2613_v63 }
 0x2f5   :  { %v2615_v48 = vpop.f32.mrf.mxu0 }
 0x32f   :  { %v2651_v16 = vpop.f32.mrf.mxu1 }
 0x330   :  { %v2652_v52 = vadd.f32 %v2651_v16, %v2379_v5 }
 0x331   :  { %v2653_v30 = vpop.f32.mrf.mxu1 }
 0x332   :  { %v2654_v10 = vadd.f32 %v2653_v30, %v2379_v5  ;;  %2742 = vst [vmem:[#allocation2 + $0x10] sm:$0xff] %v2652_v52 }
 0x333   :  { %v2655_v23 = vpop.f32.mrf.mxu1 }
 0x334   :  { %2743 = vst [vmem:[#allocation2 + $0x18] sm:$0xff] %v2654_v10 }
 0x335   :  { %v2656_v20 = vpop.f32.mrf.mxu1 }
 0x36f   :  { %v2692_v26 = vpop.f32.mrf.mxu0 }
 0x370   :  { %v2693_v33 = vadd.f32 %v2692_v26, %v2379_v5 }
 0x371   :  { %v2694_v53 = vpop.f32.mrf.mxu0 }
 0x372   :  { %2744 = vst [vmem:[#allocation2 + $0x20] sm:$0xff] %v2693_v33  ;;  %v2695_v1 = vadd.f32 %v2694_v53, %v2379_v5 }
 0x373   :  { %v2696_v44 = vpop.f32.mrf.mxu0 }
 0x374   :  { %2745 = vst [vmem:[#allocation2 + $0x28] sm:$0xff] %v2695_v1 }
 0x375   :  { %v2697_v18 = vpop.f32.mrf.mxu0 }
 0x3b0   :  { %v2733_v41 = vpop.f32.mrf.mxu1 }
 0x3b1   :  { %v2734_v24 = vadd.f32 %v2733_v41, %v2379_v5 }
 0x3b2   :  { %v2735_v54 = vpop.f32.mrf.mxu1 }
 0x3b3   :  { %2746 = vst [vmem:[#allocation2 + $0x30] sm:$0xff] %v2734_v24  ;;  %v2736_v11 = vadd.f32 %v2735_v54, %v2379_v5 }
 0x3b4   :  { %v2737_v46 = vpop.f32.mrf.mxu1 }
 0x3b5   :  { %2747 = vst [vmem:[#allocation2 + $0x38] sm:$0xff] %v2736_v11 }
 0x3b6   :  { %v2738_v4 = vpop.f32.mrf.mxu1 }
 0x3b7   :  { %4056 = shalt.err (!%p4053_p4)
}
 0x3b8   :  { %2757 = dma.vmem_to_hbm [thread:$0]  %s2755_s20, 1024, %s5162_s7, [#allocation3]  }
 0x3b9   :  { %4065 = dma.done.wait [#allocation3], 1024  }
 0x3ba   :  { %4066 = vsyncadd [#allocation3], 4294966272 }
 0x3bb   :  { %2761 = vsyncpa [#allocation3], 1 }

</bundles_post_ra>
